<compile_context>
chip_gen: v5e
topology: v5e:2x2
jax: 0.10.0
libtpu: 0.0.40
codegen_flags: <defaults>
</compile_context>

<pallas_src>
import jax
import jax.numpy as jnp
from jax.experimental import pallas as pl
from jax.experimental.pallas import tpu as pltpu

# ----------------------------- model config (small, synthetic) ----------------
VOCAB = 64      # vocab size (EOT token == VOCAB - 1, the highest id)
CTX = 8         # context length (multiple of 8 sublanes)
WIDTH = 32      # transformer width (d_model)
HEADS = 2
HEAD_DIM = WIDTH // HEADS
LAYERS = 2
EMBED = 16      # text_projection output dim
EMBED_PAD = 128 # lane-dense padded output width
LN_EPS = 1e-5


def _layer_norm(x, g, b):
    mu = jnp.mean(x, axis=-1, keepdims=True)
    var = jnp.mean(jnp.square(x - mu), axis=-1, keepdims=True)
    return (x - mu) * jax.lax.rsqrt(var + LN_EPS) * g + b


# ----------------------------- fused Pallas kernel -----------------------------
def clip_fused_kernel(eot_ref, x_ref, mask_ref, pvec_ref, wqkv_ref, bqkv_ref,
                      wo_ref, w1_ref, b1_ref, w2_ref, lnf_ref, proj_ref,
                      o_ref, x_scr):
    """One sample (grid axis 0 == batch, 'parallel') through the whole text tower.

      eot_ref  : (B,) int32 SMEM   flat EOT positions (scalar prefetch)
      x_ref    : (1, S, D)         this sample's token+positional embeddings
      mask_ref : (S, S)            additive causal bias (0 / -1e9)
      pvec_ref : (L, 6, 1, D)      ln1_g, ln1_b, ln2_g, ln2_b, b_attn_out, b_fc2
      wqkv_ref : (L, D, 3D) bf16   fused QKV weight (scale folded into W_q)
      bqkv_ref : (L, 1, 3D) f32    fused QKV bias   (scale folded into b_q)
      wo_ref   : (L, D, D)  bf16
      w1_ref   : (L, D, 4D) bf16 ; b1_ref: (L, 1, 4D) f32 ; w2_ref: (L, 4D, D) bf16
      lnf_ref  : (2, 1, D)         ln_final gamma / beta
      proj_ref : (D, EMBED_PAD)    text_projection zero-padded to 128 lanes (f32)
      o_ref    : (1, 1, EMBED_PAD)
      x_scr    : (S, D) f32 VMEM   final activations (for dynamic EOT-row read)
    """
    D = WIDTH
    b = pl.program_id(0)
    x = x_ref[0]                       # (S, D) f32 residual stream, stays on-chip
    mask = mask_ref[...]               # (S, S)

    for l in range(LAYERS):            # static unroll over layers (toy L=2)
        # ---------------- causal multi-head self-attention -----------------
        xn = _layer_norm(x, pvec_ref[l, 0], pvec_ref[l, 1])
        qkv = jnp.dot(xn.astype(jnp.bfloat16), wqkv_ref[l],
                      preferred_element_type=jnp.float32) + bqkv_ref[l]   # (S, 3D)
        q = qkv[:, :D].astype(jnp.bfloat16)        # scale already folded into W_q
        k = qkv[:, D:2 * D].astype(jnp.bfloat16)
        v = qkv[:, 2 * D:].astype(jnp.bfloat16)

        heads = []
        for h in range(HEADS):         # tiny static loop (H=2)
            lo, hi = h * HEAD_DIM, (h + 1) * HEAD_DIM
            # contract the head dim of q and k directly (no .T / XLU transpose)
            s = jax.lax.dot_general(q[:, lo:hi], k[:, lo:hi],
                                    (((1,), (1,)), ((), ())),
                                    preferred_element_type=jnp.float32) + mask
            s = s - jnp.max(s, axis=-1, keepdims=True)        # f32 softmax stats
            p = jnp.exp(s)
            p = p * pl.reciprocal(jnp.sum(p, axis=-1, keepdims=True), approx=True)
            heads.append(jnp.dot(p.astype(jnp.bfloat16), v[:, lo:hi],
                                 preferred_element_type=jnp.float32))
        attn = jnp.concatenate(heads, axis=-1)                 # (S, D)
        x = x + jnp.dot(attn.astype(jnp.bfloat16), wo_ref[l],
                        preferred_element_type=jnp.float32) + pvec_ref[l, 4]

        # ---------------- MLP (QuickGELU); elementwise kept in f32 ----------
        xn2 = _layer_norm(x, pvec_ref[l, 2], pvec_ref[l, 3])
        h1 = jnp.dot(xn2.astype(jnp.bfloat16), w1_ref[l],
                     preferred_element_type=jnp.float32) + b1_ref[l]
        h1 = h1 * jax.nn.sigmoid(1.702 * h1)
        x = x + jnp.dot(h1.astype(jnp.bfloat16), w2_ref[l],
                        preferred_element_type=jnp.float32) + pvec_ref[l, 5]

    # ---- head: scalar-indexed EOT row gather, ln_final on 1 row, projection ---
    x_scr[...] = x
    row = x_scr[pl.ds(eot_ref[b], 1), :]                       # (1, D)
    row = _layer_norm(row, lnf_ref[0], lnf_ref[1])
    o_ref[...] = jnp.dot(row, proj_ref[...],
                         preferred_element_type=jnp.float32).reshape(1, 1, EMBED_PAD)


# ----------------------------- parameter packing -------------------------------
def pack_params(params):
    """Stack per-layer weights; fold attention scale into W_q/b_q; bf16 matmul weights."""
    D = WIDTH
    scale = HEAD_DIM ** -0.5
    pvec_l, wqkv_l, bqkv_l, wo_l, w1_l, b1_l, w2_l = [], [], [], [], [], [], []
    for lp in params["layers"]:
        (ln1_g, ln1_b, wqkv, bqkv, wo, bo, ln2_g, ln2_b, w1, b1, w2, b2) = lp
        wqkv_s = wqkv.at[:, :D].multiply(scale)     # fold 1/sqrt(Hd) into W_q
        bqkv_s = bqkv.at[:, :D].multiply(scale)     # ... and into b_q
        pvec_l.append(jnp.stack([ln1_g, ln1_b, ln2_g, ln2_b, bo, b2], axis=0))
        wqkv_l.append(wqkv_s)
        bqkv_l.append(bqkv_s)
        wo_l.append(wo)
        w1_l.append(w1)
        b1_l.append(b1)
        w2_l.append(w2)
    pvec = jnp.stack(pvec_l, axis=0)                               # (L, 6, 1, D) f32
    wqkv = jnp.stack(wqkv_l, axis=0).astype(jnp.bfloat16)          # (L, D, 3D)
    bqkv = jnp.stack(bqkv_l, axis=0)                               # (L, 1, 3D) f32
    wo = jnp.stack(wo_l, axis=0).astype(jnp.bfloat16)              # (L, D, D)
    w1 = jnp.stack(w1_l, axis=0).astype(jnp.bfloat16)              # (L, D, 4D)
    b1 = jnp.stack(b1_l, axis=0)                                   # (L, 1, 4D) f32
    w2 = jnp.stack(w2_l, axis=0).astype(jnp.bfloat16)              # (L, 4D, D)
    lnf = jnp.stack([params["ln_final_g"], params["ln_final_b"]], axis=0)   # (2,1,D)
    proj = jnp.zeros((D, EMBED_PAD), jnp.float32).at[:, :EMBED].set(
        params["text_projection"])                                 # f32 (tiny, final)
    return (pvec, wqkv, bqkv, wo, w1, b1, w2, lnf, proj)


# ----------------------------- wrapper -----------------------------------------
@jax.jit
def clip_encode_text(tokens, params):
    """Pallas implementation of ClipWrapper.forward(tokens)."""
    B, S = tokens.shape
    D = WIDTH
    x = (params["token_embedding"][tokens]
         + params["positional_embedding"][None]).astype(jnp.float32)  # (B, S, D)

    eot = jnp.argmax(tokens, axis=-1).astype(jnp.int32)               # (B,) EOT pos

    rows = jnp.arange(S)
    mask = jnp.where(rows[None, :] <= rows[:, None], 0.0, -1e9).astype(jnp.float32)

    packed = pack_params(params)

    # rough advisory cost estimate for the fused call
    N = B * S
    flops = LAYERS * (2 * N * D * 3 * D                       # fused QKV
                      + 2 * B * HEADS * 2 * S * S * HEAD_DIM  # scores + PV
                      + 2 * N * D * D                         # Wo
                      + 2 * 2 * N * D * 4 * D)                # MLP fc1 + fc2
    flops += 2 * B * D * EMBED_PAD                            # projection
    trans = LAYERS * (B * HEADS * S * S + N * 4 * D)          # exp + sigmoid
    bytes_accessed = (int(x.size) * 4 + int(mask.size) * 4 + B * 4
                      + sum(int(a.size) * a.dtype.itemsize for a in packed)
                      + B * EMBED_PAD * 4)

    grid_spec = pltpu.PrefetchScalarGridSpec(
        num_scalar_prefetch=1,                 # eot indices live in SMEM
        grid=(B,),                             # batch axis -> "parallel" (v7x 2 TCs)
        in_specs=[
            pl.BlockSpec((1, S, D), lambda b, eot: (b, 0, 0)),                 # x
            pl.BlockSpec((S, S), lambda b, eot: (0, 0)),                       # mask
            pl.BlockSpec((LAYERS, 6, 1, D), lambda b, eot: (0, 0, 0, 0)),      # pvec
            pl.BlockSpec((LAYERS, D, 3 * D), lambda b, eot: (0, 0, 0)),        # wqkv
            pl.BlockSpec((LAYERS, 1, 3 * D), lambda b, eot: (0, 0, 0)),        # bqkv
            pl.BlockSpec((LAYERS, D, D), lambda b, eot: (0, 0, 0)),            # wo
            pl.BlockSpec((LAYERS, D, 4 * D), lambda b, eot: (0, 0, 0)),        # w1
            pl.BlockSpec((LAYERS, 1, 4 * D), lambda b, eot: (0, 0, 0)),        # b1
            pl.BlockSpec((LAYERS, 4 * D, D), lambda b, eot: (0, 0, 0)),        # w2
            pl.BlockSpec((2, 1, D), lambda b, eot: (0, 0, 0)),                 # lnf
            pl.BlockSpec((D, EMBED_PAD), lambda b, eot: (0, 0)),               # proj
        ],
        out_specs=pl.BlockSpec((1, 1, EMBED_PAD), lambda b, eot: (b, 0, 0)),
        scratch_shapes=[pltpu.VMEM((S, D), jnp.float32)],
    )

    out = pl.pallas_call(
        clip_fused_kernel,
        out_shape=jax.ShapeDtypeStruct((B, 1, EMBED_PAD), jnp.float32),
        grid_spec=grid_spec,
        compiler_params=pltpu.CompilerParams(
            dimension_semantics=("parallel",),
            # weights + activations + double-buffer headroom; < v7x 64 MiB physical
            vmem_limit_bytes=48 * 1024 * 1024),
        cost_estimate=pl.CostEstimate(flops=int(flops),
                                      transcendentals=int(trans),
                                      bytes_accessed=int(bytes_accessed)),
    )(eot, x, mask, *packed)
    return out[:, 0, :EMBED]                                          # (B, EMBED)


# ----------------------------- pure-JAX reference (f32) ------------------------
def ref_encode_text(tokens, params):
    x = params["token_embedding"][tokens] + params["positional_embedding"][None]
    x = x.astype(jnp.float32)
    B, S, D = x.shape
    row = jax.lax.broadcasted_iota(jnp.int32, (S, S), 0)
    col = jax.lax.broadcasted_iota(jnp.int32, (S, S), 1)
    bias = jnp.where(col <= row, 0.0, -1e9).astype(jnp.float32)
    scale = 1.0 / (HEAD_DIM ** 0.5)
    for lp in params["layers"]:
        (ln1_g, ln1_b, wqkv, bqkv, wo, bo, ln2_g, ln2_b, w1, b1, w2, b2) = lp
        xn = _layer_norm(x, ln1_g, ln1_b)
        qkv = xn @ wqkv + bqkv
        q, k, v = jnp.split(qkv, 3, axis=-1)
        q = q.reshape(B, S, HEADS, HEAD_DIM).transpose(0, 2, 1, 3)
        k = k.reshape(B, S, HEADS, HEAD_DIM).transpose(0, 2, 1, 3)
        v = v.reshape(B, S, HEADS, HEAD_DIM).transpose(0, 2, 1, 3)
        s = jnp.einsum("bhqd,bhkd->bhqk", q, k) * scale + bias
        s = s - jnp.max(s, axis=-1, keepdims=True)
        p = jnp.exp(s)
        p = p / jnp.sum(p, axis=-1, keepdims=True)
        o = jnp.einsum("bhqk,bhkd->bhqd", p, v).transpose(0, 2, 1, 3).reshape(B, S, D)
        x = x + o @ wo + bo
        xn2 = _layer_norm(x, ln2_g, ln2_b)
        h1 = xn2 @ w1 + b1
        h1 = h1 * jax.nn.sigmoid(1.702 * h1)
        x = x + h1 @ w2 + b2
    xn = _layer_norm(x, params["ln_final_g"], params["ln_final_b"])
    eot = jnp.argmax(tokens, axis=-1)
    gathered = xn[jnp.arange(B), eot]
    return gathered @ params["text_projection"]


# ----------------------------- deterministic params ----------------------------
def init_params(key):
    keys = jax.random.split(key, 4 + LAYERS)
    params = {
        "token_embedding": 0.02 * jax.random.normal(keys[0], (VOCAB, WIDTH), jnp.float32),
        "positional_embedding": 0.01 * jax.random.normal(keys[1], (CTX, WIDTH), jnp.float32),
        "ln_final_g": jnp.ones((1, WIDTH), jnp.float32),
        "ln_final_b": jnp.zeros((1, WIDTH), jnp.float32),
        "text_projection": (WIDTH ** -0.5) * jax.random.normal(keys[2], (WIDTH, EMBED), jnp.float32),
        "layers": [],
    }
    for l in range(LAYERS):
        lk = jax.random.split(keys[4 + l], 4)
        layer = (
            jnp.ones((1, WIDTH), jnp.float32),                                   # ln1 gamma
            jnp.zeros((1, WIDTH), jnp.float32),                                  # ln1 beta
            0.02 * jax.random.normal(lk[0], (WIDTH, 3 * WIDTH), jnp.float32),    # W_qkv
            jnp.zeros((1, 3 * WIDTH), jnp.float32),                              # b_qkv
            0.02 * jax.random.normal(lk[1], (WIDTH, WIDTH), jnp.float32),        # W_out
            jnp.zeros((1, WIDTH), jnp.float32),                                  # b_out
            jnp.ones((1, WIDTH), jnp.float32),                                   # ln2 gamma
            jnp.zeros((1, WIDTH), jnp.float32),                                  # ln2 beta
            0.02 * jax.random.normal(lk[2], (WIDTH, 4 * WIDTH), jnp.float32),    # W_fc1
            jnp.zeros((1, 4 * WIDTH), jnp.float32),                              # b_fc1
            0.02 * jax.random.normal(lk[3], (4 * WIDTH, WIDTH), jnp.float32),    # W_fc2
            jnp.zeros((1, WIDTH), jnp.float32),                                  # b_fc2
        )
        params["layers"].append(layer)
    return params


# ----------------------------- main --------------------------------------------
if __name__ == "__main__":
    key = jax.random.PRNGKey(0)
    pkey, tkey = jax.random.split(key)
    params = init_params(pkey)

    B = 2
    # tokens: [SOT=1, random body, EOT=VOCAB-1 (highest id), padding=0]
    tokens = jax.random.randint(tkey, (B, CTX), 2, VOCAB - 2, dtype=jnp.int32)
    tokens = tokens.at[:, 0].set(1)
    tokens = tokens.at[0, 5].set(VOCAB - 1)   # EOT for sample 0 at position 5
    tokens = tokens.at[0, 6:].set(0)
    tokens = tokens.at[1, 7].set(VOCAB - 1)   # EOT for sample 1 at position 7

    out = jax.block_until_ready(clip_encode_text(tokens, params))
    ref = jax.block_until_ready(ref_encode_text(tokens, params))

    assert out.shape == (B, EMBED), out.shape
    # Tolerance loosened vs. the pure-f32 version because matmul operands are now
    # bf16 (per perf review); statistics/residuals stay f32, so errors are small.
    max_err = float(jnp.max(jnp.abs(out - ref)))
    assert jnp.allclose(out, ref, atol=5e-2, rtol=5e-2), max_err
    print("KERNEL_OK")
</pallas_src>

<mosaic_0001>
module attributes {stable_mosaic.version = 11 : i64} {
  func.func @clip_fused_kernel(%arg0: i32, %arg1: memref<2xi32, #tpu.memory_space<smem>>, %arg2: memref<1x8x32xf32, #tpu.memory_space<vmem>>, %arg3: memref<8x8xf32, #tpu.memory_space<vmem>>, %arg4: memref<2x6x1x32xf32, #tpu.memory_space<vmem>>, %arg5: memref<2x32x96xbf16, #tpu.memory_space<vmem>>, %arg6: memref<2x1x96xf32, #tpu.memory_space<vmem>>, %arg7: memref<2x32x32xbf16, #tpu.memory_space<vmem>>, %arg8: memref<2x32x128xbf16, #tpu.memory_space<vmem>>, %arg9: memref<2x1x128xf32, #tpu.memory_space<vmem>>, %arg10: memref<2x128x32xbf16, #tpu.memory_space<vmem>>, %arg11: memref<2x1x32xf32, #tpu.memory_space<vmem>>, %arg12: memref<32x128xf32, #tpu.memory_space<vmem>>, %arg13: memref<1x1x128xf32, #tpu.memory_space<vmem>>, %arg14: memref<8x32xf32, #tpu.memory_space<vmem>>) attributes {dimension_semantics = [#tpu.dimension_semantics<parallel>], iteration_bounds = array<i64: 2>, scalar_prefetch = 1 : i64, scratch_operands = 1 : i64, tpu.core_type = #tpu.core_type<tc>, window_params = [{transform_indices = @transform_0, window_bounds = array<i64: 1, 8, 32>}, {pipeline_mode = #tpu.pipeline_mode<synchronous>, transform_indices = @transform_1, window_bounds = array<i64: 8, 8>}, {pipeline_mode = #tpu.pipeline_mode<synchronous>, transform_indices = @transform_2, window_bounds = array<i64: 2, 6, 1, 32>}, {pipeline_mode = #tpu.pipeline_mode<synchronous>, transform_indices = @transform_3, window_bounds = array<i64: 2, 32, 96>}, {pipeline_mode = #tpu.pipeline_mode<synchronous>, transform_indices = @transform_4, window_bounds = array<i64: 2, 1, 96>}, {pipeline_mode = #tpu.pipeline_mode<synchronous>, transform_indices = @transform_5, window_bounds = array<i64: 2, 32, 32>}, {pipeline_mode = #tpu.pipeline_mode<synchronous>, transform_indices = @transform_6, window_bounds = array<i64: 2, 32, 128>}, {pipeline_mode = #tpu.pipeline_mode<synchronous>, transform_indices = @transform_7, window_bounds = array<i64: 2, 1, 128>}, {pipeline_mode = #tpu.pipeline_mode<synchronous>, transform_indices = @transform_8, window_bounds = array<i64: 2, 128, 32>}, {pipeline_mode = #tpu.pipeline_mode<synchronous>, transform_indices = @transform_9, window_bounds = array<i64: 2, 1, 32>}, {pipeline_mode = #tpu.pipeline_mode<synchronous>, transform_indices = @transform_10, window_bounds = array<i64: 32, 128>}, {transform_indices = @transform_11, window_bounds = array<i64: 1, 1, 128>}]} {
    %c0 = arith.constant 0 : index
    %c0_0 = arith.constant 0 : index
    %c0_1 = arith.constant 0 : index
    %0 = vector.load %arg2[%c0, %c0_0, %c0_1] : memref<1x8x32xf32, #tpu.memory_space<vmem>>, vector<1x8x32xf32>
    %1 = vector.shape_cast %0 : vector<1x8x32xf32> to vector<8x32xf32>
    %c0_2 = arith.constant 0 : index
    %c0_3 = arith.constant 0 : index
    %2 = vector.load %arg3[%c0_2, %c0_3] : memref<8x8xf32, #tpu.memory_space<vmem>>, vector<8x8xf32>
    %c0_4 = arith.constant 0 : index
    %c0_5 = arith.constant 0 : index
    %c0_6 = arith.constant 0 : index
    %c0_7 = arith.constant 0 : index
    %3 = vector.load %arg4[%c0_4, %c0_5, %c0_6, %c0_7] : memref<2x6x1x32xf32, #tpu.memory_space<vmem>>, vector<1x1x1x32xf32>
    %4 = vector.shape_cast %3 : vector<1x1x1x32xf32> to vector<1x32xf32>
    %c0_8 = arith.constant 0 : index
    %c1 = arith.constant 1 : index
    %c0_9 = arith.constant 0 : index
    %c0_10 = arith.constant 0 : index
    %5 = vector.load %arg4[%c0_8, %c1, %c0_9, %c0_10] : memref<2x6x1x32xf32, #tpu.memory_space<vmem>>, vector<1x1x1x32xf32>
    %6 = vector.shape_cast %5 : vector<1x1x1x32xf32> to vector<1x32xf32>
    %cst = arith.constant dense<0.000000e+00> : vector<8xf32>
    %7 = vector.multi_reduction <add>, %1, %cst [1] : vector<8x32xf32> to vector<8xf32>
    %8 = vector.shape_cast %7 : vector<8xf32> to vector<8x1xf32>
    %cst_11 = arith.constant 3.200000e+01 : f32
    %9 = vector.broadcast %cst_11 : f32 to vector<8x1xf32>
    %10 = arith.divf %8, %9 : vector<8x1xf32>
    %11 = vector.broadcast %10 : vector<8x1xf32> to vector<8x32xf32>
    %12 = arith.subf %1, %11 : vector<8x32xf32>
    %13 = arith.mulf %12, %12 : vector<8x32xf32>
    %cst_12 = arith.constant dense<0.000000e+00> : vector<8xf32>
    %14 = vector.multi_reduction <add>, %13, %cst_12 [1] : vector<8x32xf32> to vector<8xf32>
    %15 = vector.shape_cast %14 : vector<8xf32> to vector<8x1xf32>
    %cst_13 = arith.constant 3.200000e+01 : f32
    %16 = vector.broadcast %cst_13 : f32 to vector<8x1xf32>
    %17 = arith.divf %15, %16 : vector<8x1xf32>
    %18 = vector.broadcast %10 : vector<8x1xf32> to vector<8x32xf32>
    %19 = arith.subf %1, %18 : vector<8x32xf32>
    %cst_14 = arith.constant 9.99999974E-6 : f32
    %20 = vector.broadcast %cst_14 : f32 to vector<8x1xf32>
    %21 = arith.addf %17, %20 : vector<8x1xf32>
    %22 = math.rsqrt %21 : vector<8x1xf32>
    %23 = vector.broadcast %22 : vector<8x1xf32> to vector<8x32xf32>
    %24 = arith.mulf %19, %23 : vector<8x32xf32>
    %25 = vector.broadcast %4 : vector<1x32xf32> to vector<8x32xf32>
    %26 = arith.mulf %24, %25 : vector<8x32xf32>
    %27 = vector.broadcast %6 : vector<1x32xf32> to vector<8x32xf32>
    %28 = arith.addf %26, %27 : vector<8x32xf32>
    %29 = arith.truncf %28 : vector<8x32xf32> to vector<8x32xbf16>
    %c0_15 = arith.constant 0 : index
    %c0_16 = arith.constant 0 : index
    %c0_17 = arith.constant 0 : index
    %30 = vector.load %arg5[%c0_15, %c0_16, %c0_17] : memref<2x32x96xbf16, #tpu.memory_space<vmem>>, vector<1x32x96xbf16>
    %31 = vector.shape_cast %30 : vector<1x32x96xbf16> to vector<32x96xbf16>
    %cst_18 = arith.constant dense<0.000000e+00> : vector<8x96xf32>
    %32 = tpu.matmul %29, %31, %cst_18 {dimension_numbers = #tpu.dot_dimension_numbers<[1], [0], [0], [1], [0, 0, 1, 1], [], []>} : vector<8x32xbf16>, vector<32x96xbf16>, vector<8x96xf32> -> vector<8x96xf32>
    %c0_19 = arith.constant 0 : index
    %c0_20 = arith.constant 0 : index
    %c0_21 = arith.constant 0 : index
    %33 = vector.load %arg6[%c0_19, %c0_20, %c0_21] : memref<2x1x96xf32, #tpu.memory_space<vmem>>, vector<1x1x96xf32>
    %34 = vector.shape_cast %33 : vector<1x1x96xf32> to vector<1x96xf32>
    %35 = vector.broadcast %34 : vector<1x96xf32> to vector<8x96xf32>
    %36 = arith.addf %32, %35 : vector<8x96xf32>
    %37 = vector.extract_strided_slice %36 {offsets = [0, 0], sizes = [8, 32], strides = [1, 1]} : vector<8x96xf32> to vector<8x32xf32>
    %38 = arith.truncf %37 : vector<8x32xf32> to vector<8x32xbf16>
    %39 = vector.extract_strided_slice %36 {offsets = [0, 32], sizes = [8, 32], strides = [1, 1]} : vector<8x96xf32> to vector<8x32xf32>
    %40 = arith.truncf %39 : vector<8x32xf32> to vector<8x32xbf16>
    %41 = vector.extract_strided_slice %36 {offsets = [0, 64], sizes = [8, 32], strides = [1, 1]} : vector<8x96xf32> to vector<8x32xf32>
    %42 = arith.truncf %41 : vector<8x32xf32> to vector<8x32xbf16>
    %43 = vector.extract_strided_slice %38 {offsets = [0, 0], sizes = [8, 16], strides = [1, 1]} : vector<8x32xbf16> to vector<8x16xbf16>
    %44 = vector.extract_strided_slice %40 {offsets = [0, 0], sizes = [8, 16], strides = [1, 1]} : vector<8x32xbf16> to vector<8x16xbf16>
    %cst_22 = arith.constant dense<0.000000e+00> : vector<8x8xf32>
    %45 = tpu.matmul %43, %44, %cst_22 {dimension_numbers = #tpu.dot_dimension_numbers<[1], [1], [0], [0], [0, 0, 1, 0], [], []>} : vector<8x16xbf16>, vector<8x16xbf16>, vector<8x8xf32> -> vector<8x8xf32>
    %46 = arith.addf %45, %2 : vector<8x8xf32>
    %cst_23 = arith.constant dense<0xFF800000> : vector<8xf32>
    %47 = vector.multi_reduction <maximumf>, %46, %cst_23 [1] : vector<8x8xf32> to vector<8xf32>
    %48 = vector.shape_cast %47 : vector<8xf32> to vector<8x1xf32>
    %49 = vector.broadcast %48 : vector<8x1xf32> to vector<8x8xf32>
    %50 = arith.subf %46, %49 : vector<8x8xf32>
    %51 = math.exp %50 : vector<8x8xf32>
    %cst_24 = arith.constant dense<0.000000e+00> : vector<8xf32>
    %52 = vector.multi_reduction <add>, %51, %cst_24 [1] : vector<8x8xf32> to vector<8xf32>
    %53 = vector.shape_cast %52 : vector<8xf32> to vector<8x1xf32>
    %54 = tpu.reciprocal %53 {approx = true} : vector<8x1xf32> -> vector<8x1xf32>
    %55 = vector.broadcast %54 : vector<8x1xf32> to vector<8x8xf32>
    %56 = arith.mulf %51, %55 : vector<8x8xf32>
    %57 = arith.truncf %56 : vector<8x8xf32> to vector<8x8xbf16>
    %58 = vector.extract_strided_slice %42 {offsets = [0, 0], sizes = [8, 16], strides = [1, 1]} : vector<8x32xbf16> to vector<8x16xbf16>
    %cst_25 = arith.constant dense<0.000000e+00> : vector<8x16xf32>
    %59 = tpu.matmul %57, %58, %cst_25 {dimension_numbers = #tpu.dot_dimension_numbers<[1], [0], [0], [1], [0, 0, 1, 1], [], []>} : vector<8x8xbf16>, vector<8x16xbf16>, vector<8x16xf32> -> vector<8x16xf32>
    %60 = vector.extract_strided_slice %38 {offsets = [0, 16], sizes = [8, 16], strides = [1, 1]} : vector<8x32xbf16> to vector<8x16xbf16>
    %61 = vector.extract_strided_slice %40 {offsets = [0, 16], sizes = [8, 16], strides = [1, 1]} : vector<8x32xbf16> to vector<8x16xbf16>
    %cst_26 = arith.constant dense<0.000000e+00> : vector<8x8xf32>
    %62 = tpu.matmul %60, %61, %cst_26 {dimension_numbers = #tpu.dot_dimension_numbers<[1], [1], [0], [0], [0, 0, 1, 0], [], []>} : vector<8x16xbf16>, vector<8x16xbf16>, vector<8x8xf32> -> vector<8x8xf32>
    %63 = arith.addf %62, %2 : vector<8x8xf32>
    %cst_27 = arith.constant dense<0xFF800000> : vector<8xf32>
    %64 = vector.multi_reduction <maximumf>, %63, %cst_27 [1] : vector<8x8xf32> to vector<8xf32>
    %65 = vector.shape_cast %64 : vector<8xf32> to vector<8x1xf32>
    %66 = vector.broadcast %65 : vector<8x1xf32> to vector<8x8xf32>
    %67 = arith.subf %63, %66 : vector<8x8xf32>
    %68 = math.exp %67 : vector<8x8xf32>
    %cst_28 = arith.constant dense<0.000000e+00> : vector<8xf32>
    %69 = vector.multi_reduction <add>, %68, %cst_28 [1] : vector<8x8xf32> to vector<8xf32>
    %70 = vector.shape_cast %69 : vector<8xf32> to vector<8x1xf32>
    %71 = tpu.reciprocal %70 {approx = true} : vector<8x1xf32> -> vector<8x1xf32>
    %72 = vector.broadcast %71 : vector<8x1xf32> to vector<8x8xf32>
    %73 = arith.mulf %68, %72 : vector<8x8xf32>
    %74 = arith.truncf %73 : vector<8x8xf32> to vector<8x8xbf16>
    %75 = vector.extract_strided_slice %42 {offsets = [0, 16], sizes = [8, 16], strides = [1, 1]} : vector<8x32xbf16> to vector<8x16xbf16>
    %cst_29 = arith.constant dense<0.000000e+00> : vector<8x16xf32>
    %76 = tpu.matmul %74, %75, %cst_29 {dimension_numbers = #tpu.dot_dimension_numbers<[1], [0], [0], [1], [0, 0, 1, 1], [], []>} : vector<8x8xbf16>, vector<8x16xbf16>, vector<8x16xf32> -> vector<8x16xf32>
    %77 = tpu.concatenate %59, %76 in 1 : vector<8x16xf32>, vector<8x16xf32> -> vector<8x32xf32>
    %78 = arith.truncf %77 : vector<8x32xf32> to vector<8x32xbf16>
    %c0_30 = arith.constant 0 : index
    %c0_31 = arith.constant 0 : index
    %c0_32 = arith.constant 0 : index
    %79 = vector.load %arg7[%c0_30, %c0_31, %c0_32] : memref<2x32x32xbf16, #tpu.memory_space<vmem>>, vector<1x32x32xbf16>
    %80 = vector.shape_cast %79 : vector<1x32x32xbf16> to vector<32x32xbf16>
    %cst_33 = arith.constant dense<0.000000e+00> : vector<8x32xf32>
    %81 = tpu.matmul %78, %80, %cst_33 {dimension_numbers = #tpu.dot_dimension_numbers<[1], [0], [0], [1], [0, 0, 1, 1], [], []>} : vector<8x32xbf16>, vector<32x32xbf16>, vector<8x32xf32> -> vector<8x32xf32>
    %82 = arith.addf %1, %81 : vector<8x32xf32>
    %c0_34 = arith.constant 0 : index
    %c4 = arith.constant 4 : index
    %c0_35 = arith.constant 0 : index
    %c0_36 = arith.constant 0 : index
    %83 = vector.load %arg4[%c0_34, %c4, %c0_35, %c0_36] : memref<2x6x1x32xf32, #tpu.memory_space<vmem>>, vector<1x1x1x32xf32>
    %84 = vector.shape_cast %83 : vector<1x1x1x32xf32> to vector<1x32xf32>
    %85 = vector.broadcast %84 : vector<1x32xf32> to vector<8x32xf32>
    %86 = arith.addf %82, %85 : vector<8x32xf32>
    %c0_37 = arith.constant 0 : index
    %c2 = arith.constant 2 : index
    %c0_38 = arith.constant 0 : index
    %c0_39 = arith.constant 0 : index
    %87 = vector.load %arg4[%c0_37, %c2, %c0_38, %c0_39] : memref<2x6x1x32xf32, #tpu.memory_space<vmem>>, vector<1x1x1x32xf32>
    %88 = vector.shape_cast %87 : vector<1x1x1x32xf32> to vector<1x32xf32>
    %c0_40 = arith.constant 0 : index
    %c3 = arith.constant 3 : index
    %c0_41 = arith.constant 0 : index
    %c0_42 = arith.constant 0 : index
    %89 = vector.load %arg4[%c0_40, %c3, %c0_41, %c0_42] : memref<2x6x1x32xf32, #tpu.memory_space<vmem>>, vector<1x1x1x32xf32>
    %90 = vector.shape_cast %89 : vector<1x1x1x32xf32> to vector<1x32xf32>
    %cst_43 = arith.constant dense<0.000000e+00> : vector<8xf32>
    %91 = vector.multi_reduction <add>, %86, %cst_43 [1] : vector<8x32xf32> to vector<8xf32>
    %92 = vector.shape_cast %91 : vector<8xf32> to vector<8x1xf32>
    %cst_44 = arith.constant 3.200000e+01 : f32
    %93 = vector.broadcast %cst_44 : f32 to vector<8x1xf32>
    %94 = arith.divf %92, %93 : vector<8x1xf32>
    %95 = vector.broadcast %94 : vector<8x1xf32> to vector<8x32xf32>
    %96 = arith.subf %86, %95 : vector<8x32xf32>
    %97 = arith.mulf %96, %96 : vector<8x32xf32>
    %cst_45 = arith.constant dense<0.000000e+00> : vector<8xf32>
    %98 = vector.multi_reduction <add>, %97, %cst_45 [1] : vector<8x32xf32> to vector<8xf32>
    %99 = vector.shape_cast %98 : vector<8xf32> to vector<8x1xf32>
    %cst_46 = arith.constant 3.200000e+01 : f32
    %100 = vector.broadcast %cst_46 : f32 to vector<8x1xf32>
    %101 = arith.divf %99, %100 : vector<8x1xf32>
    %102 = vector.broadcast %94 : vector<8x1xf32> to vector<8x32xf32>
    %103 = arith.subf %86, %102 : vector<8x32xf32>
    %cst_47 = arith.constant 9.99999974E-6 : f32
    %104 = vector.broadcast %cst_47 : f32 to vector<8x1xf32>
    %105 = arith.addf %101, %104 : vector<8x1xf32>
    %106 = math.rsqrt %105 : vector<8x1xf32>
    %107 = vector.broadcast %106 : vector<8x1xf32> to vector<8x32xf32>
    %108 = arith.mulf %103, %107 : vector<8x32xf32>
    %109 = vector.broadcast %88 : vector<1x32xf32> to vector<8x32xf32>
    %110 = arith.mulf %108, %109 : vector<8x32xf32>
    %111 = vector.broadcast %90 : vector<1x32xf32> to vector<8x32xf32>
    %112 = arith.addf %110, %111 : vector<8x32xf32>
    %113 = arith.truncf %112 : vector<8x32xf32> to vector<8x32xbf16>
    %c0_48 = arith.constant 0 : index
    %c0_49 = arith.constant 0 : index
    %c0_50 = arith.constant 0 : index
    %114 = vector.load %arg8[%c0_48, %c0_49, %c0_50] : memref<2x32x128xbf16, #tpu.memory_space<vmem>>, vector<1x32x128xbf16>
    %115 = vector.shape_cast %114 : vector<1x32x128xbf16> to vector<32x128xbf16>
    %cst_51 = arith.constant dense<0.000000e+00> : vector<8x128xf32>
    %116 = tpu.matmul %113, %115, %cst_51 {dimension_numbers = #tpu.dot_dimension_numbers<[1], [0], [0], [1], [0, 0, 1, 1], [], []>} : vector<8x32xbf16>, vector<32x128xbf16>, vector<8x128xf32> -> vector<8x128xf32>
    %c0_52 = arith.constant 0 : index
    %c0_53 = arith.constant 0 : index
    %c0_54 = arith.constant 0 : index
    %117 = vector.load %arg9[%c0_52, %c0_53, %c0_54] : memref<2x1x128xf32, #tpu.memory_space<vmem>>, vector<1x1x128xf32>
    %118 = vector.shape_cast %117 : vector<1x1x128xf32> to vector<1x128xf32>
    %119 = vector.broadcast %118 : vector<1x128xf32> to vector<8x128xf32>
    %120 = arith.addf %116, %119 : vector<8x128xf32>
    %cst_55 = arith.constant 1.702000e+00 : f32
    %121 = vector.broadcast %cst_55 : f32 to vector<8x128xf32>
    %122 = arith.mulf %121, %120 : vector<8x128xf32>
    %123 = arith.negf %122 : vector<8x128xf32>
    %124 = math.exp %123 : vector<8x128xf32>
    %cst_56 = arith.constant 1.000000e+00 : f32
    %125 = vector.broadcast %cst_56 : f32 to vector<8x128xf32>
    %126 = arith.addf %125, %124 : vector<8x128xf32>
    %127 = arith.divf %125, %126 : vector<8x128xf32>
    %128 = arith.mulf %120, %127 : vector<8x128xf32>
    %129 = arith.truncf %128 : vector<8x128xf32> to vector<8x128xbf16>
    %c0_57 = arith.constant 0 : index
    %c0_58 = arith.constant 0 : index
    %c0_59 = arith.constant 0 : index
    %130 = vector.load %arg10[%c0_57, %c0_58, %c0_59] : memref<2x128x32xbf16, #tpu.memory_space<vmem>>, vector<1x128x32xbf16>
    %131 = vector.shape_cast %130 : vector<1x128x32xbf16> to vector<128x32xbf16>
    %cst_60 = arith.constant dense<0.000000e+00> : vector<8x32xf32>
    %132 = tpu.matmul %129, %131, %cst_60 {dimension_numbers = #tpu.dot_dimension_numbers<[1], [0], [0], [1], [0, 0, 1, 1], [], []>} : vector<8x128xbf16>, vector<128x32xbf16>, vector<8x32xf32> -> vector<8x32xf32>
    %133 = arith.addf %86, %132 : vector<8x32xf32>
    %c0_61 = arith.constant 0 : index
    %c5 = arith.constant 5 : index
    %c0_62 = arith.constant 0 : index
    %c0_63 = arith.constant 0 : index
    %134 = vector.load %arg4[%c0_61, %c5, %c0_62, %c0_63] : memref<2x6x1x32xf32, #tpu.memory_space<vmem>>, vector<1x1x1x32xf32>
    %135 = vector.shape_cast %134 : vector<1x1x1x32xf32> to vector<1x32xf32>
    %136 = vector.broadcast %135 : vector<1x32xf32> to vector<8x32xf32>
    %137 = arith.addf %133, %136 : vector<8x32xf32>
    %c1_64 = arith.constant 1 : index
    %c0_65 = arith.constant 0 : index
    %c0_66 = arith.constant 0 : index
    %c0_67 = arith.constant 0 : index
    %138 = vector.load %arg4[%c1_64, %c0_65, %c0_66, %c0_67] : memref<2x6x1x32xf32, #tpu.memory_space<vmem>>, vector<1x1x1x32xf32>
    %139 = vector.shape_cast %138 : vector<1x1x1x32xf32> to vector<1x32xf32>
    %c1_68 = arith.constant 1 : index
    %c1_69 = arith.constant 1 : index
    %c0_70 = arith.constant 0 : index
    %c0_71 = arith.constant 0 : index
    %140 = vector.load %arg4[%c1_68, %c1_69, %c0_70, %c0_71] : memref<2x6x1x32xf32, #tpu.memory_space<vmem>>, vector<1x1x1x32xf32>
    %141 = vector.shape_cast %140 : vector<1x1x1x32xf32> to vector<1x32xf32>
    %cst_72 = arith.constant dense<0.000000e+00> : vector<8xf32>
    %142 = vector.multi_reduction <add>, %137, %cst_72 [1] : vector<8x32xf32> to vector<8xf32>
    %143 = vector.shape_cast %142 : vector<8xf32> to vector<8x1xf32>
    %cst_73 = arith.constant 3.200000e+01 : f32
    %144 = vector.broadcast %cst_73 : f32 to vector<8x1xf32>
    %145 = arith.divf %143, %144 : vector<8x1xf32>
    %146 = vector.broadcast %145 : vector<8x1xf32> to vector<8x32xf32>
    %147 = arith.subf %137, %146 : vector<8x32xf32>
    %148 = arith.mulf %147, %147 : vector<8x32xf32>
    %cst_74 = arith.constant dense<0.000000e+00> : vector<8xf32>
    %149 = vector.multi_reduction <add>, %148, %cst_74 [1] : vector<8x32xf32> to vector<8xf32>
    %150 = vector.shape_cast %149 : vector<8xf32> to vector<8x1xf32>
    %cst_75 = arith.constant 3.200000e+01 : f32
    %151 = vector.broadcast %cst_75 : f32 to vector<8x1xf32>
    %152 = arith.divf %150, %151 : vector<8x1xf32>
    %153 = vector.broadcast %145 : vector<8x1xf32> to vector<8x32xf32>
    %154 = arith.subf %137, %153 : vector<8x32xf32>
    %cst_76 = arith.constant 9.99999974E-6 : f32
    %155 = vector.broadcast %cst_76 : f32 to vector<8x1xf32>
    %156 = arith.addf %152, %155 : vector<8x1xf32>
    %157 = math.rsqrt %156 : vector<8x1xf32>
    %158 = vector.broadcast %157 : vector<8x1xf32> to vector<8x32xf32>
    %159 = arith.mulf %154, %158 : vector<8x32xf32>
    %160 = vector.broadcast %139 : vector<1x32xf32> to vector<8x32xf32>
    %161 = arith.mulf %159, %160 : vector<8x32xf32>
    %162 = vector.broadcast %141 : vector<1x32xf32> to vector<8x32xf32>
    %163 = arith.addf %161, %162 : vector<8x32xf32>
    %164 = arith.truncf %163 : vector<8x32xf32> to vector<8x32xbf16>
    %c1_77 = arith.constant 1 : index
    %c0_78 = arith.constant 0 : index
    %c0_79 = arith.constant 0 : index
    %165 = vector.load %arg5[%c1_77, %c0_78, %c0_79] : memref<2x32x96xbf16, #tpu.memory_space<vmem>>, vector<1x32x96xbf16>
    %166 = vector.shape_cast %165 : vector<1x32x96xbf16> to vector<32x96xbf16>
    %cst_80 = arith.constant dense<0.000000e+00> : vector<8x96xf32>
    %167 = tpu.matmul %164, %166, %cst_80 {dimension_numbers = #tpu.dot_dimension_numbers<[1], [0], [0], [1], [0, 0, 1, 1], [], []>} : vector<8x32xbf16>, vector<32x96xbf16>, vector<8x96xf32> -> vector<8x96xf32>
    %c1_81 = arith.constant 1 : index
    %c0_82 = arith.constant 0 : index
    %c0_83 = arith.constant 0 : index
    %168 = vector.load %arg6[%c1_81, %c0_82, %c0_83] : memref<2x1x96xf32, #tpu.memory_space<vmem>>, vector<1x1x96xf32>
    %169 = vector.shape_cast %168 : vector<1x1x96xf32> to vector<1x96xf32>
    %170 = vector.broadcast %169 : vector<1x96xf32> to vector<8x96xf32>
    %171 = arith.addf %167, %170 : vector<8x96xf32>
    %172 = vector.extract_strided_slice %171 {offsets = [0, 0], sizes = [8, 32], strides = [1, 1]} : vector<8x96xf32> to vector<8x32xf32>
    %173 = arith.truncf %172 : vector<8x32xf32> to vector<8x32xbf16>
    %174 = vector.extract_strided_slice %171 {offsets = [0, 32], sizes = [8, 32], strides = [1, 1]} : vector<8x96xf32> to vector<8x32xf32>
    %175 = arith.truncf %174 : vector<8x32xf32> to vector<8x32xbf16>
    %176 = vector.extract_strided_slice %171 {offsets = [0, 64], sizes = [8, 32], strides = [1, 1]} : vector<8x96xf32> to vector<8x32xf32>
    %177 = arith.truncf %176 : vector<8x32xf32> to vector<8x32xbf16>
    %178 = vector.extract_strided_slice %173 {offsets = [0, 0], sizes = [8, 16], strides = [1, 1]} : vector<8x32xbf16> to vector<8x16xbf16>
    %179 = vector.extract_strided_slice %175 {offsets = [0, 0], sizes = [8, 16], strides = [1, 1]} : vector<8x32xbf16> to vector<8x16xbf16>
    %cst_84 = arith.constant dense<0.000000e+00> : vector<8x8xf32>
    %180 = tpu.matmul %178, %179, %cst_84 {dimension_numbers = #tpu.dot_dimension_numbers<[1], [1], [0], [0], [0, 0, 1, 0], [], []>} : vector<8x16xbf16>, vector<8x16xbf16>, vector<8x8xf32> -> vector<8x8xf32>
    %181 = arith.addf %180, %2 : vector<8x8xf32>
    %cst_85 = arith.constant dense<0xFF800000> : vector<8xf32>
    %182 = vector.multi_reduction <maximumf>, %181, %cst_85 [1] : vector<8x8xf32> to vector<8xf32>
    %183 = vector.shape_cast %182 : vector<8xf32> to vector<8x1xf32>
    %184 = vector.broadcast %183 : vector<8x1xf32> to vector<8x8xf32>
    %185 = arith.subf %181, %184 : vector<8x8xf32>
    %186 = math.exp %185 : vector<8x8xf32>
    %cst_86 = arith.constant dense<0.000000e+00> : vector<8xf32>
    %187 = vector.multi_reduction <add>, %186, %cst_86 [1] : vector<8x8xf32> to vector<8xf32>
    %188 = vector.shape_cast %187 : vector<8xf32> to vector<8x1xf32>
    %189 = tpu.reciprocal %188 {approx = true} : vector<8x1xf32> -> vector<8x1xf32>
    %190 = vector.broadcast %189 : vector<8x1xf32> to vector<8x8xf32>
    %191 = arith.mulf %186, %190 : vector<8x8xf32>
    %192 = arith.truncf %191 : vector<8x8xf32> to vector<8x8xbf16>
    %193 = vector.extract_strided_slice %177 {offsets = [0, 0], sizes = [8, 16], strides = [1, 1]} : vector<8x32xbf16> to vector<8x16xbf16>
    %cst_87 = arith.constant dense<0.000000e+00> : vector<8x16xf32>
    %194 = tpu.matmul %192, %193, %cst_87 {dimension_numbers = #tpu.dot_dimension_numbers<[1], [0], [0], [1], [0, 0, 1, 1], [], []>} : vector<8x8xbf16>, vector<8x16xbf16>, vector<8x16xf32> -> vector<8x16xf32>
    %195 = vector.extract_strided_slice %173 {offsets = [0, 16], sizes = [8, 16], strides = [1, 1]} : vector<8x32xbf16> to vector<8x16xbf16>
    %196 = vector.extract_strided_slice %175 {offsets = [0, 16], sizes = [8, 16], strides = [1, 1]} : vector<8x32xbf16> to vector<8x16xbf16>
    %cst_88 = arith.constant dense<0.000000e+00> : vector<8x8xf32>
    %197 = tpu.matmul %195, %196, %cst_88 {dimension_numbers = #tpu.dot_dimension_numbers<[1], [1], [0], [0], [0, 0, 1, 0], [], []>} : vector<8x16xbf16>, vector<8x16xbf16>, vector<8x8xf32> -> vector<8x8xf32>
    %198 = arith.addf %197, %2 : vector<8x8xf32>
    %cst_89 = arith.constant dense<0xFF800000> : vector<8xf32>
    %199 = vector.multi_reduction <maximumf>, %198, %cst_89 [1] : vector<8x8xf32> to vector<8xf32>
    %200 = vector.shape_cast %199 : vector<8xf32> to vector<8x1xf32>
    %201 = vector.broadcast %200 : vector<8x1xf32> to vector<8x8xf32>
    %202 = arith.subf %198, %201 : vector<8x8xf32>
    %203 = math.exp %202 : vector<8x8xf32>
    %cst_90 = arith.constant dense<0.000000e+00> : vector<8xf32>
    %204 = vector.multi_reduction <add>, %203, %cst_90 [1] : vector<8x8xf32> to vector<8xf32>
    %205 = vector.shape_cast %204 : vector<8xf32> to vector<8x1xf32>
    %206 = tpu.reciprocal %205 {approx = true} : vector<8x1xf32> -> vector<8x1xf32>
    %207 = vector.broadcast %206 : vector<8x1xf32> to vector<8x8xf32>
    %208 = arith.mulf %203, %207 : vector<8x8xf32>
    %209 = arith.truncf %208 : vector<8x8xf32> to vector<8x8xbf16>
    %210 = vector.extract_strided_slice %177 {offsets = [0, 16], sizes = [8, 16], strides = [1, 1]} : vector<8x32xbf16> to vector<8x16xbf16>
    %cst_91 = arith.constant dense<0.000000e+00> : vector<8x16xf32>
    %211 = tpu.matmul %209, %210, %cst_91 {dimension_numbers = #tpu.dot_dimension_numbers<[1], [0], [0], [1], [0, 0, 1, 1], [], []>} : vector<8x8xbf16>, vector<8x16xbf16>, vector<8x16xf32> -> vector<8x16xf32>
    %212 = tpu.concatenate %194, %211 in 1 : vector<8x16xf32>, vector<8x16xf32> -> vector<8x32xf32>
    %213 = arith.truncf %212 : vector<8x32xf32> to vector<8x32xbf16>
    %c1_92 = arith.constant 1 : index
    %c0_93 = arith.constant 0 : index
    %c0_94 = arith.constant 0 : index
    %214 = vector.load %arg7[%c1_92, %c0_93, %c0_94] : memref<2x32x32xbf16, #tpu.memory_space<vmem>>, vector<1x32x32xbf16>
    %215 = vector.shape_cast %214 : vector<1x32x32xbf16> to vector<32x32xbf16>
    %cst_95 = arith.constant dense<0.000000e+00> : vector<8x32xf32>
    %216 = tpu.matmul %213, %215, %cst_95 {dimension_numbers = #tpu.dot_dimension_numbers<[1], [0], [0], [1], [0, 0, 1, 1], [], []>} : vector<8x32xbf16>, vector<32x32xbf16>, vector<8x32xf32> -> vector<8x32xf32>
    %217 = arith.addf %137, %216 : vector<8x32xf32>
    %c1_96 = arith.constant 1 : index
    %c4_97 = arith.constant 4 : index
    %c0_98 = arith.constant 0 : index
    %c0_99 = arith.constant 0 : index
    %218 = vector.load %arg4[%c1_96, %c4_97, %c0_98, %c0_99] : memref<2x6x1x32xf32, #tpu.memory_space<vmem>>, vector<1x1x1x32xf32>
    %219 = vector.shape_cast %218 : vector<1x1x1x32xf32> to vector<1x32xf32>
    %220 = vector.broadcast %219 : vector<1x32xf32> to vector<8x32xf32>
    %221 = arith.addf %217, %220 : vector<8x32xf32>
    %c1_100 = arith.constant 1 : index
    %c2_101 = arith.constant 2 : index
    %c0_102 = arith.constant 0 : index
    %c0_103 = arith.constant 0 : index
    %222 = vector.load %arg4[%c1_100, %c2_101, %c0_102, %c0_103] : memref<2x6x1x32xf32, #tpu.memory_space<vmem>>, vector<1x1x1x32xf32>
    %223 = vector.shape_cast %222 : vector<1x1x1x32xf32> to vector<1x32xf32>
    %c1_104 = arith.constant 1 : index
    %c3_105 = arith.constant 3 : index
    %c0_106 = arith.constant 0 : index
    %c0_107 = arith.constant 0 : index
    %224 = vector.load %arg4[%c1_104, %c3_105, %c0_106, %c0_107] : memref<2x6x1x32xf32, #tpu.memory_space<vmem>>, vector<1x1x1x32xf32>
    %225 = vector.shape_cast %224 : vector<1x1x1x32xf32> to vector<1x32xf32>
    %cst_108 = arith.constant dense<0.000000e+00> : vector<8xf32>
    %226 = vector.multi_reduction <add>, %221, %cst_108 [1] : vector<8x32xf32> to vector<8xf32>
    %227 = vector.shape_cast %226 : vector<8xf32> to vector<8x1xf32>
    %cst_109 = arith.constant 3.200000e+01 : f32
    %228 = vector.broadcast %cst_109 : f32 to vector<8x1xf32>
    %229 = arith.divf %227, %228 : vector<8x1xf32>
    %230 = vector.broadcast %229 : vector<8x1xf32> to vector<8x32xf32>
    %231 = arith.subf %221, %230 : vector<8x32xf32>
    %232 = arith.mulf %231, %231 : vector<8x32xf32>
    %cst_110 = arith.constant dense<0.000000e+00> : vector<8xf32>
    %233 = vector.multi_reduction <add>, %232, %cst_110 [1] : vector<8x32xf32> to vector<8xf32>
    %234 = vector.shape_cast %233 : vector<8xf32> to vector<8x1xf32>
    %cst_111 = arith.constant 3.200000e+01 : f32
    %235 = vector.broadcast %cst_111 : f32 to vector<8x1xf32>
    %236 = arith.divf %234, %235 : vector<8x1xf32>
    %237 = vector.broadcast %229 : vector<8x1xf32> to vector<8x32xf32>
    %238 = arith.subf %221, %237 : vector<8x32xf32>
    %cst_112 = arith.constant 9.99999974E-6 : f32
    %239 = vector.broadcast %cst_112 : f32 to vector<8x1xf32>
    %240 = arith.addf %236, %239 : vector<8x1xf32>
    %241 = math.rsqrt %240 : vector<8x1xf32>
    %242 = vector.broadcast %241 : vector<8x1xf32> to vector<8x32xf32>
    %243 = arith.mulf %238, %242 : vector<8x32xf32>
    %244 = vector.broadcast %223 : vector<1x32xf32> to vector<8x32xf32>
    %245 = arith.mulf %243, %244 : vector<8x32xf32>
    %246 = vector.broadcast %225 : vector<1x32xf32> to vector<8x32xf32>
    %247 = arith.addf %245, %246 : vector<8x32xf32>
    %248 = arith.truncf %247 : vector<8x32xf32> to vector<8x32xbf16>
    %c1_113 = arith.constant 1 : index
    %c0_114 = arith.constant 0 : index
    %c0_115 = arith.constant 0 : index
    %249 = vector.load %arg8[%c1_113, %c0_114, %c0_115] : memref<2x32x128xbf16, #tpu.memory_space<vmem>>, vector<1x32x128xbf16>
    %250 = vector.shape_cast %249 : vector<1x32x128xbf16> to vector<32x128xbf16>
    %cst_116 = arith.constant dense<0.000000e+00> : vector<8x128xf32>
    %251 = tpu.matmul %248, %250, %cst_116 {dimension_numbers = #tpu.dot_dimension_numbers<[1], [0], [0], [1], [0, 0, 1, 1], [], []>} : vector<8x32xbf16>, vector<32x128xbf16>, vector<8x128xf32> -> vector<8x128xf32>
    %c1_117 = arith.constant 1 : index
    %c0_118 = arith.constant 0 : index
    %c0_119 = arith.constant 0 : index
    %252 = vector.load %arg9[%c1_117, %c0_118, %c0_119] : memref<2x1x128xf32, #tpu.memory_space<vmem>>, vector<1x1x128xf32>
    %253 = vector.shape_cast %252 : vector<1x1x128xf32> to vector<1x128xf32>
    %254 = vector.broadcast %253 : vector<1x128xf32> to vector<8x128xf32>
    %255 = arith.addf %251, %254 : vector<8x128xf32>
    %cst_120 = arith.constant 1.702000e+00 : f32
    %256 = vector.broadcast %cst_120 : f32 to vector<8x128xf32>
    %257 = arith.mulf %256, %255 : vector<8x128xf32>
    %258 = arith.negf %257 : vector<8x128xf32>
    %259 = math.exp %258 : vector<8x128xf32>
    %cst_121 = arith.constant 1.000000e+00 : f32
    %260 = vector.broadcast %cst_121 : f32 to vector<8x128xf32>
    %261 = arith.addf %260, %259 : vector<8x128xf32>
    %262 = arith.divf %260, %261 : vector<8x128xf32>
    %263 = arith.mulf %255, %262 : vector<8x128xf32>
    %264 = arith.truncf %263 : vector<8x128xf32> to vector<8x128xbf16>
    %c1_122 = arith.constant 1 : index
    %c0_123 = arith.constant 0 : index
    %c0_124 = arith.constant 0 : index
    %265 = vector.load %arg10[%c1_122, %c0_123, %c0_124] : memref<2x128x32xbf16, #tpu.memory_space<vmem>>, vector<1x128x32xbf16>
    %266 = vector.shape_cast %265 : vector<1x128x32xbf16> to vector<128x32xbf16>
    %cst_125 = arith.constant dense<0.000000e+00> : vector<8x32xf32>
    %267 = tpu.matmul %264, %266, %cst_125 {dimension_numbers = #tpu.dot_dimension_numbers<[1], [0], [0], [1], [0, 0, 1, 1], [], []>} : vector<8x128xbf16>, vector<128x32xbf16>, vector<8x32xf32> -> vector<8x32xf32>
    %268 = arith.addf %221, %267 : vector<8x32xf32>
    %c1_126 = arith.constant 1 : index
    %c5_127 = arith.constant 5 : index
    %c0_128 = arith.constant 0 : index
    %c0_129 = arith.constant 0 : index
    %269 = vector.load %arg4[%c1_126, %c5_127, %c0_128, %c0_129] : memref<2x6x1x32xf32, #tpu.memory_space<vmem>>, vector<1x1x1x32xf32>
    %270 = vector.shape_cast %269 : vector<1x1x1x32xf32> to vector<1x32xf32>
    %271 = vector.broadcast %270 : vector<1x32xf32> to vector<8x32xf32>
    %272 = arith.addf %268, %271 : vector<8x32xf32>
    %c0_130 = arith.constant 0 : index
    %c0_131 = arith.constant 0 : index
    %273 = vector.load %arg14[%c0_130, %c0_131] : memref<8x32xf32, #tpu.memory_space<vmem>>, vector<8x32xf32>
    tpu.vector_store %arg14[%c0_130, %c0_131], %272 {strides = array<i32>} : memref<8x32xf32, #tpu.memory_space<vmem>>, vector<8x32xf32>,
    %274 = arith.index_cast %arg0 : i32 to index
    %275 = memref.load %arg1[%274] : memref<2xi32, #tpu.memory_space<smem>>
    %276 = arith.index_cast %275 : i32 to index
    %c0_132 = arith.constant 0 : index
    %277 = vector.load %arg14[%276, %c0_132] : memref<8x32xf32, #tpu.memory_space<vmem>>, vector<1x32xf32>
    %c0_133 = arith.constant 0 : index
    %c0_134 = arith.constant 0 : index
    %c0_135 = arith.constant 0 : index
    %278 = vector.load %arg11[%c0_133, %c0_134, %c0_135] : memref<2x1x32xf32, #tpu.memory_space<vmem>>, vector<1x1x32xf32>
    %279 = vector.shape_cast %278 : vector<1x1x32xf32> to vector<1x32xf32>
    %c1_136 = arith.constant 1 : index
    %c0_137 = arith.constant 0 : index
    %c0_138 = arith.constant 0 : index
    %280 = vector.load %arg11[%c1_136, %c0_137, %c0_138] : memref<2x1x32xf32, #tpu.memory_space<vmem>>, vector<1x1x32xf32>
    %281 = vector.shape_cast %280 : vector<1x1x32xf32> to vector<1x32xf32>
    %cst_139 = arith.constant dense<0.000000e+00> : vector<1xf32>
    %282 = vector.multi_reduction <add>, %277, %cst_139 [1] : vector<1x32xf32> to vector<1xf32>
    %283 = vector.shape_cast %282 : vector<1xf32> to vector<1x1xf32>
    %cst_140 = arith.constant 3.200000e+01 : f32
    %284 = vector.broadcast %cst_140 : f32 to vector<1x1xf32>
    %285 = arith.divf %283, %284 : vector<1x1xf32>
    %286 = vector.broadcast %285 : vector<1x1xf32> to vector<1x32xf32>
    %287 = arith.subf %277, %286 : vector<1x32xf32>
    %288 = arith.mulf %287, %287 : vector<1x32xf32>
    %cst_141 = arith.constant dense<0.000000e+00> : vector<1xf32>
    %289 = vector.multi_reduction <add>, %288, %cst_141 [1] : vector<1x32xf32> to vector<1xf32>
    %290 = vector.shape_cast %289 : vector<1xf32> to vector<1x1xf32>
    %cst_142 = arith.constant 3.200000e+01 : f32
    %291 = vector.broadcast %cst_142 : f32 to vector<1x1xf32>
    %292 = arith.divf %290, %291 : vector<1x1xf32>
    %293 = vector.broadcast %285 : vector<1x1xf32> to vector<1x32xf32>
    %294 = arith.subf %277, %293 : vector<1x32xf32>
    %cst_143 = arith.constant 9.99999974E-6 : f32
    %295 = vector.broadcast %cst_143 : f32 to vector<1x1xf32>
    %296 = arith.addf %292, %295 : vector<1x1xf32>
    %297 = math.rsqrt %296 : vector<1x1xf32>
    %298 = vector.broadcast %297 : vector<1x1xf32> to vector<1x32xf32>
    %299 = arith.mulf %294, %298 : vector<1x32xf32>
    %300 = arith.mulf %299, %279 : vector<1x32xf32>
    %301 = arith.addf %300, %281 : vector<1x32xf32>
    %c0_144 = arith.constant 0 : index
    %c0_145 = arith.constant 0 : index
    %302 = vector.load %arg12[%c0_144, %c0_145] : memref<32x128xf32, #tpu.memory_space<vmem>>, vector<32x128xf32>
    %cst_146 = arith.constant dense<0.000000e+00> : vector<1x128xf32>
    %303 = tpu.matmul %301, %302, %cst_146 {dimension_numbers = #tpu.dot_dimension_numbers<[1], [0], [0], [1], [0, 0, 1, 1], [], []>} : vector<1x32xf32>, vector<32x128xf32>, vector<1x128xf32> -> vector<1x128xf32>
    %304 = vector.shape_cast %303 : vector<1x128xf32> to vector<1x1x128xf32>
    %c0_147 = arith.constant 0 : index
    %c0_148 = arith.constant 0 : index
    %c0_149 = arith.constant 0 : index
    %305 = vector.load %arg13[%c0_147, %c0_148, %c0_149] : memref<1x1x128xf32, #tpu.memory_space<vmem>>, vector<1x1x128xf32>
    tpu.vector_store %arg13[%c0_147, %c0_148, %c0_149], %304 {strides = array<i32>} : memref<1x1x128xf32, #tpu.memory_space<vmem>>, vector<1x1x128xf32>,
    return
  }
  func.func @transform_0(%arg0: i32, %arg1: memref<2xi32, #tpu.memory_space<smem>>) -> (i32, i32, i32) {
    %c0_i32 = arith.constant 0 : i32
    %c0_i32_0 = arith.constant 0 : i32
    %c0_i32_1 = arith.constant 0 : i32
    return %arg0, %c0_i32, %c0_i32_0 : i32, i32, i32
  }
  func.func @transform_1(%arg0: i32, %arg1: memref<2xi32, #tpu.memory_space<smem>>) -> (i32, i32) {
    %c0_i32 = arith.constant 0 : i32
    %c0_i32_0 = arith.constant 0 : i32
    %c0_i32_1 = arith.constant 0 : i32
    return %c0_i32, %c0_i32_0 : i32, i32
  }
  func.func @transform_2(%arg0: i32, %arg1: memref<2xi32, #tpu.memory_space<smem>>) -> (i32, i32, i32, i32) {
    %c0_i32 = arith.constant 0 : i32
    %c0_i32_0 = arith.constant 0 : i32
    %c0_i32_1 = arith.constant 0 : i32
    %c0_i32_2 = arith.constant 0 : i32
    %c0_i32_3 = arith.constant 0 : i32
    return %c0_i32, %c0_i32_0, %c0_i32_1, %c0_i32_2 : i32, i32, i32, i32
  }
  func.func @transform_3(%arg0: i32, %arg1: memref<2xi32, #tpu.memory_space<smem>>) -> (i32, i32, i32) {
    %c0_i32 = arith.constant 0 : i32
    %c0_i32_0 = arith.constant 0 : i32
    %c0_i32_1 = arith.constant 0 : i32
    %c0_i32_2 = arith.constant 0 : i32
    return %c0_i32, %c0_i32_0, %c0_i32_1 : i32, i32, i32
  }
  func.func @transform_4(%arg0: i32, %arg1: memref<2xi32, #tpu.memory_space<smem>>) -> (i32, i32, i32) {
    %c0_i32 = arith.constant 0 : i32
    %c0_i32_0 = arith.constant 0 : i32
    %c0_i32_1 = arith.constant 0 : i32
    %c0_i32_2 = arith.constant 0 : i32
    return %c0_i32, %c0_i32_0, %c0_i32_1 : i32, i32, i32
  }
  func.func @transform_5(%arg0: i32, %arg1: memref<2xi32, #tpu.memory_space<smem>>) -> (i32, i32, i32) {
    %c0_i32 = arith.constant 0 : i32
    %c0_i32_0 = arith.constant 0 : i32
    %c0_i32_1 = arith.constant 0 : i32
    %c0_i32_2 = arith.constant 0 : i32
    return %c0_i32, %c0_i32_0, %c0_i32_1 : i32, i32, i32
  }
  func.func @transform_6(%arg0: i32, %arg1: memref<2xi32, #tpu.memory_space<smem>>) -> (i32, i32, i32) {
    %c0_i32 = arith.constant 0 : i32
    %c0_i32_0 = arith.constant 0 : i32
    %c0_i32_1 = arith.constant 0 : i32
    %c0_i32_2 = arith.constant 0 : i32
    return %c0_i32, %c0_i32_0, %c0_i32_1 : i32, i32, i32
  }
  func.func @transform_7(%arg0: i32, %arg1: memref<2xi32, #tpu.memory_space<smem>>) -> (i32, i32, i32) {
    %c0_i32 = arith.constant 0 : i32
    %c0_i32_0 = arith.constant 0 : i32
    %c0_i32_1 = arith.constant 0 : i32
    %c0_i32_2 = arith.constant 0 : i32
    return %c0_i32, %c0_i32_0, %c0_i32_1 : i32, i32, i32
  }
  func.func @transform_8(%arg0: i32, %arg1: memref<2xi32, #tpu.memory_space<smem>>) -> (i32, i32, i32) {
    %c0_i32 = arith.constant 0 : i32
    %c0_i32_0 = arith.constant 0 : i32
    %c0_i32_1 = arith.constant 0 : i32
    %c0_i32_2 = arith.constant 0 : i32
    return %c0_i32, %c0_i32_0, %c0_i32_1 : i32, i32, i32
  }
  func.func @transform_9(%arg0: i32, %arg1: memref<2xi32, #tpu.memory_space<smem>>) -> (i32, i32, i32) {
    %c0_i32 = arith.constant 0 : i32
    %c0_i32_0 = arith.constant 0 : i32
    %c0_i32_1 = arith.constant 0 : i32
    %c0_i32_2 = arith.constant 0 : i32
    return %c0_i32, %c0_i32_0, %c0_i32_1 : i32, i32, i32
  }
  func.func @transform_10(%arg0: i32, %arg1: memref<2xi32, #tpu.memory_space<smem>>) -> (i32, i32) {
    %c0_i32 = arith.constant 0 : i32
    %c0_i32_0 = arith.constant 0 : i32
    %c0_i32_1 = arith.constant 0 : i32
    return %c0_i32, %c0_i32_0 : i32, i32
  }
  func.func @transform_11(%arg0: i32, %arg1: memref<2xi32, #tpu.memory_space<smem>>) -> (i32, i32, i32) {
    %c0_i32 = arith.constant 0 : i32
    %c0_i32_0 = arith.constant 0 : i32
    %c0_i32_1 = arith.constant 0 : i32
    return %arg0, %c0_i32, %c0_i32_0 : i32, i32, i32
  }
}

</mosaic_0001>

<bundles_post_ra>
// kernel: clip_encode_text.1
= control target key start
LH: loop header
LB: loop body
LE: loop exit
PB: predicated region body
PF: predicated region fallthrough
CT: control target
= control target key end

     0   :  { %s1735_s24 = smov [#allocation4]   ;;  %s2142_s0 = inlined_call_operand.vmem [shape: s32[2], index: 0, kind: input, shape index: {}]   ;;  %s2143_s1 = inlined_call_operand.vmem [shape: f32[2,8,32], index: 1, kind: input, shape index: {}]   ;;  %s2144_s2 = inlined_call_operand.vmem [shape: f32[8,8], index: 2, kind: input, shape index: {}]   ;;  %s2145_s3 = inlined_call_operand.vmem [shape: f32[2,6,1,32], index: 3, kind: input, shape index: {}]   ;;  %s2146_s4 = inlined_call_operand.vmem [shape: bf16[2,32,96], index: 4, kind: input, shape index: {}]   ;;  %s2147_s5 = inlined_call_operand.vmem [shape: f32[2,1,96], index: 5, kind: input, shape index: {}]   ;;  %s2148_s6 = inlined_call_operand.vmem [shape: bf16[2,32,32], index: 6, kind: input, shape index: {}]   ;;  %s2149_s7 = inlined_call_operand.vmem [shape: bf16[2,32,128], index: 7, kind: input, shape index: {}]   ;;  %s2150_s8 = inlined_call_operand.vmem [shape: f32[2,1,128], index: 8, kind: input, shape index: {}]   ;;  %s2151_s9 = inlined_call_operand.vmem [shape: bf16[2,128,32], index: 9, kind: input, shape index: {}]   ;;  %s2152_s10 = inlined_call_operand.vmem [shape: f32[2,1,32], index: 10, kind: input, shape index: {}]   ;;  %s2153_s11 = inlined_call_operand.vmem [shape: f32[32,128], index: 11, kind: input, shape index: {}]   ;;  %s2154_s12 = inlined_call_operand.hbm [shape: f32[2,1,128], index: 12, kind: output, shape index: {}]  }
   0x1   :  { %2161 = sst [smem:[#allocation9_spill]] %s2143_s1  ;;  %s18_s23 = sshll.u32 %s2142_s0, 4  ;;  %s19_s23 = int_to_ptr.vmem [resolvable:$true] %s18_s23 }
   0x2   :  { %2162 = sst [smem:[#allocation10_spill]] %s2144_s2 }
   0x3   :  { %21 = dma.vmem_to_smem %s19_s23, 16, %s1735_s24, [#allocation3] }
   0x4   :  { %1713 = dma.done.wait [#allocation3], 16 }
   0x5   :  { %1714 = vsyncadd [#allocation3], 4294967280 }
   0x6   :  { %24 = sfence }
   0x7   :  { %25 = vsyncpa [#allocation6], 0 }
   0x8   :  { %27 = vsyncpa [#allocation6 + $0x1], 0  ;;  %s1811_s25 = smov 0   ;;  %s1813_s26 = smov 0  }
   0x9   :  { %s1815_s27 = smov 0   ;;  %s1817_s28 = smov 0  }
   0xa LB: > { %s1832_s0 = sadd.s32 4294967295, %s1733_s28   ;;  %s1352_s29 = sadd.s32 4294967294, %s1733_s28   ;;  %s1733_s28 = sphi %s1817_s28, %s2176_s28   ;;  %s1729_s27 = sphi %s1815_s27, %s2175_s27   ;;  %s1725_s26 = sphi %s1813_s26, %s2174_s26   ;;  %s1721_s25 = sphi %s1811_s25, %s2173_s25  }
   0xb   : > { %s1836_s30 = sadd.s32 1, %s1733_s28   ;;  %s276_s13 = sadd.s32 1, %s1729_s27 }
   0xc   : > { %s273_s14 = ssub.s32 %s1733_s28, %s1836_s30  ;;  %p286_p0 = scmp.ne.s32.totalorder %s1729_s27, %s1725_s26 }
   0xd   : > { %p274_p1 = scmp.eq.s32.totalorder %s273_s14, 0  ;;  %p287_p2 = scmp.eq.s32.totalorder %s1832_s0, 1 }
   0xe   : > { %p292_p3 = scmp.ne.s32.totalorder %s1725_s26, %s1721_s25  ;;  %p293_p4 = scmp.eq.s32.totalorder %s1352_s29, 1 }
   0xf   : > { %s1847_s15 = scalar_select %p274_p1, %s1729_s27, %s276_s13  }
  0x10   : > { %p1849_p5 = por %p287_p2, %p286_p0  ;;  %p1853_p6 = por %p293_p4, %p292_p3 }
  0x11   : > { %p1355_p7 = scmp.ge.s32.totalorder %s1733_s28, 1  ;;  %p348_p8 = scmp.lt.s32.totalorder %s1733_s28, 3 }
  0x13   : > { %p349_p9 = pnand %p1355_p7, %p348_p8 }
  0x14   : > { %p386_p10 = scmp.lt.s32.totalorder (!%p349_p9), %s1832_s0, 1  ;;  %s2165_s1 = sld [smem:[#allocation9_spill]] (!%p349_p9) }
  0x15   : > { %352 = sbr.rel (%p349_p9) target bundleno = 4558 (0x11ce), region = 64  ;;  %s2159_s23 = smov (!%p349_p9), 80  }
  0x16   : > { %s2155_s24 = smov (!%p349_p9), 64   ;;  %s2158_s29 = smov (!%p349_p9), 96  }
  0x17   : > { %s2166_s2 = sld [smem:[#allocation10_spill]] (!%p349_p9)  ;;  %s2168_s14 = smov (!%p349_p9), 80  }
  0x18   : > { %s2171_s20 = smov (!%p349_p9), 64   ;;  %s2172_s13 = smov (!%p349_p9), 16  }
  0x1a   : > { %s387_s18 = scalar_select %p386_p10, %s1832_s0, 1  ;;  %vm396_vm0 = vcmask 261120   ;;  %v1736_v2 = vmov 32.0   ;;  %v1531_v14 = vld [vmem:[%s2146_s4 + $0x8] sm:$0xff]  ;;  %v1530_v15 = vld [vmem:[%s2146_s4] sm:$0xff]  ;;  %vm515_vm5 = vcmask 1043456  }
  0x1b   : > { %1621 = vrcp.f32 %v1736_v2  ;;  %464 = vmatpush.bf16.msra.mxu0 %v1531_v14  ;;  %v1605_v25 = vld [vmem:[%s2145_s3] ss:$0 sm:$0xff]  ;;  %v1606_v28 = vld [vmem:[%s2145_s3 + $0x1] ss:$0 sm:$0xff]  ;;  %vm477_vm6 = vcmask 130048   ;;  %vm497_vm7 = vcmask 64512  }
  0x1c   : > { %s1356_s19 = sshll.u32 %s387_s18, 3  ;;  %v1607_v32 = vld [vmem:[%s2147_s5] ss:$0 sm:$0xff]  ;;  %s2157_s18 = smov 48  }
  0x1d   : > { %s389_s22 = scalar_lea.vmem %s2165_s1, %s1356_s19  ;;  %v1900_v45 = vld [vmem:[%s2166_s2] sm:$0xff]  ;;  %s2160_s19 = smov 112  }
  0x1e   : > { %v1864_v0 = vld [vmem:[%s389_s22] sm:$0xff]  ;;  %s2156_s22 = smov 16  }
  0x1f   : > { %v397_v1 = vsel %vm396_vm0, %v1864_v0, 0.0  ;;  %465 = vmatpush.bf16.msra.mxu0 %v1530_v15  ;;  %v1533_v15 = vld [vmem:[%s2148_s6 + $0x8] sm:$0xff] }
  0x20   : > { %398 = vadd.xlane.f32.xlu0 %v397_v1 }
  0x21   : > { %v1622_v3 = vpop.eup %1621 }
  0x22   : > { %v401_v4 = vmul.f32 32.0, %v1622_v3  ;;  %vm405_vm1 = vweird.f32 %v1622_v3 }
  0x23   : > { %619 = vmatpush.bf16.msrb.mxu0 %v1533_v15 }
  0x24   : > { %v402_v5 = vsub.f32 1.0, %v401_v4 }
  0x26   : > { %v403_v6 = vmul.f32 %v1622_v3, %v402_v5 }
  0x28   : > { %v404_v7 = vadd.f32 %v1622_v3, %v403_v6 }
  0x2a   : > { %v1868_v8 = vsel %vm405_vm1, %v1622_v3, %v404_v7 }
  0x93   : > { %v399_v9 = vpop.xlane.xlu0 %398 }
  0x94   : > { %v407_v10 = vmul.f32 %v1868_v8, %v399_v9 }
  0x96   : > { %v408_v11 = vsub.f32 %v1864_v0, %v407_v10 }
  0x98   : > { %v409_v12 = vmul.f32 %v408_v11, %v408_v11 }
  0x9a   : > { %v410_v13 = vsel %vm396_vm0, %v409_v12, 0.0 }
  0x9b   : > { %411 = vadd.xlane.f32.xlu0 %v410_v13 }
 0x10e   : > { %v412_v16 = vpop.xlane.xlu0 %411 }
 0x10f   : > { %v413_v17 = vmul.f32 %v412_v16, %v1868_v8 }
 0x111   : > { %v414_v18 = vadd.f32 1e-05, %v413_v17 }
 0x113   : > { %1623 = vrsqrt.f32 %v414_v18  ;;  %vm421_vm3 = vweird.f32 %v414_v18 }
 0x119   : > { %v1624_v19 = vpop.eup %1623 }
 0x11a   : > { %v416_v20 = vmul.f32 %v1624_v19, %v414_v18  ;;  %vm422_vm2 = vweird.f32 %v1624_v19  ;;  %v1532_v18 = vld [vmem:[%s2148_s6] sm:$0xff] }
 0x11b   : > { %vm423_vm4 = vmor %vm421_vm3, %vm422_vm2  ;;  %620 = vmatpush.bf16.msrb.mxu0 %v1532_v18 }
 0x11c   : > { %v417_v21 = vmul.f32 %v1624_v19, %v416_v20 }
 0x11e   : > { %v418_v22 = vmul.f32 0.5, %v417_v21 }
 0x120   : > { %v419_v23 = vsub.f32 1.5, %v418_v22  ;;  %v1608_v22 = vld [vmem:[%s2145_s3 + $0x4] ss:$0 sm:$0xff] }
 0x122   : > { %v420_v24 = vmul.f32 %v1624_v19, %v419_v23 }
 0x124   : > { %v424_v26 = vsel %vm423_vm4, %v1624_v19, %v420_v24 }
 0x125   : > { %v425_v27 = vmul.f32 %v424_v26, %v408_v11 }
 0x127   : > { %v429_v29 = vmul.f32 %v1605_v25, %v425_v27 }
 0x129   : > { %v433_v30 = vadd.f32 %v1606_v28, %v429_v29 }
 0x12b   : > { %v434_v31 = vpack.c.bf16 %v433_v30, %v433_v30 }
 0x12d   : > { %1366 = vmatmul.msk.bf16.vlgmr.msra.gmra.mxu0 %vm396_vm0, %v434_v31 }
 0x1aa   : > { %v467_v33 = vpop.f32.mrf.mxu0 }
 0x1ab   : > { %v468_v34 = vadd.f32 %v1607_v32, %v467_v33  ;;  %v1534_v33 = vld [vmem:[%s2149_s7] sm:$0xff] }
 0x1ad   : > { %v471_v35 = vpack.c.bf16 %v468_v34, %v468_v34 }
 0x1af   : > { %v473_v36 = vunpack.c.l.b16 %v471_v35 }
 0x1b1   : > { %v474_v37 = vpack.c.b16 %v473_v36, %v473_v36 }
 0x1b2   : > { %v469_v38 = vpop.f32.mrf.mxu0 }
 0x1b3   : > { %534 = vrot.lane.b32.xlu0 %v474_v37, %s2159_s23  ;;  %510 = vrot.lane.b32.xlu2 %v474_v37, %s2155_s24  ;;  %s1689_s24 = scalar_lea.hbm %s2154_s12, 2 }
 0x1b4   : > { %475 = vrot.lane.b32.xlu1 %v474_v37, %s2158_s29  ;;  %s2169_s29 = smov 96  }
 0x20d   : > { %v511_v39 = vpop.permute.xlu2 %510 }
 0x20e   : > { %v517_v40 = vsel %vm515_vm5, %v511_v39, 0 }
 0x20f   : > { %526 = vmatpush.bf16.msra.mxu3 %v517_v40 }
 0x225   : > { %v535_v41 = vpop.permute.xlu0 %534 }
 0x226   : > { %v476_v42 = vpop.permute.xlu1 %475  ;;  %v540_v43 = vsel %vm477_vm6, %v535_v41, 0 }
 0x227   : > { %v482_v44 = vsel %vm477_vm6, %v476_v42, 0  ;;  %549 = vmatpush.bf16.xpose.msrb.mxu3 %v540_v43  ;;  %v1609_v43 = vld [vmem:[%s2145_s3 + $0x2] ss:$0 sm:$0xff] }
 0x228   : > { %491 = vmatpush.bf16.xpose.msra.mxu1 %v482_v44 }
 0x22f   : > { %1367 = vmatmul.msk.bf16.vlgmr.msra.gmra.mxu1 %vm477_vm6, %v471_v35 }
 0x2ac   : > { %v493_v46 = vpop.f32.mrf.mxu1 }
 0x2ad   : > { %v494_v47 = vadd.f32 %v493_v46, %v1900_v45 }
 0x2af   : > { %v498_v48 = vsel %vm497_vm7, %v494_v47, -inf }
 0x2b0   : > { %499 = vmax.xlane.f32.xlu1 %v498_v48 }
 0x2b4   : > { %v495_v49 = vpop.f32.mrf.mxu1 }
 0x2c9   : > { %567 = vrot.lane.b32.xlu1 %v474_v37, %s2157_s18  ;;  %s2170_s18 = smov 48  }
 0x323   : > { %v500_v50 = vpop.xlane.xlu1 %499 }
 0x324   : > { %v501_v51 = vsub.f32 %v494_v47, %v500_v50  ;;  %v1610_v47 = vld [vmem:[%s2145_s3 + $0x3] ss:$0 sm:$0xff] }
 0x326   : > { %v502_v52 = vmul.f32 1.442695, %v501_v51  ;;  %v1543_v51 = vld [vmem:[%s2151_s9 + $0x38] sm:$0xff] }
 0x328   : > { %1625 = vpow2.f32 %v502_v52  ;;  %v1542_v52 = vld [vmem:[%s2151_s9 + $0x30] sm:$0xff] }
 0x32e   : > { %v1626_v53 = vpop.eup %1625 }
 0x32f   : > { %v504_v54 = vsel %vm497_vm7, %v1626_v53, 0.0 }
 0x330   : > { %505 = vadd.xlane.f32.xlu2 %v504_v54  ;;  %v1540_v54 = vld [vmem:[%s2151_s9 + $0x20] sm:$0xff] }
 0x33b   : > { %v568_v55 = vpop.permute.xlu1 %567 }
 0x33c   : > { %v573_v56 = vsel %vm515_vm5, %v568_v55, 0  ;;  %v1539_v55 = vld [vmem:[%s2151_s9 + $0x18] sm:$0xff] }
 0x33d   : > { %582 = vmatpush.bf16.msra.mxu2 %v573_v56  ;;  %v1538_v56 = vld [vmem:[%s2151_s9 + $0x10] sm:$0xff] }
 0x348   : > { %532 = vrot.lane.b32.xlu2 %v474_v37, %s2160_s19 }
 0x3a3   : > { %v506_v57 = vpop.xlane.xlu2 %505 }
 0x3a4   : > { %1627 = vrcp.f32 %v506_v57  ;;  %v1537_v57 = vld [vmem:[%s2151_s9 + $0x8] sm:$0xff] }
 0x3aa   : > { %v1628_v58 = vpop.eup %1627 }
 0x3ab   : > { %v508_v59 = vmul.f32 %v1628_v58, %v1626_v53  ;;  %v533_v61 = vpop.permute.xlu2 %532  ;;  %v1541_v53 = vld [vmem:[%s2151_s9 + $0x28] sm:$0xff]  ;;  %v1611_v58 = vld [vmem:[%s2150_s8] ss:$0 sm:$0xff] }
 0x3ad   : > { %v509_v60 = vpack.c.bf16 %v508_v59, %v508_v59 }
 0x3af   : > { %1368 = vmatmul.msk.bf16.vlgmr.msra.gmra.mxu3 %vm497_vm7, %v509_v60  ;;  %v1536_v60 = vld [vmem:[%s2151_s9] sm:$0xff] }
 0x3b0   : > { %790 = vmatpush.bf16.msra.mxu3 %v1543_v51 }
 0x3b4   : > { %791 = vmatpush.bf16.msra.mxu3 %v1542_v52 }
 0x3b8   : > { %792 = vmatpush.bf16.msra.mxu3 %v1541_v53 }
 0x3bc   : > { %793 = vmatpush.bf16.msra.mxu3 %v1540_v54 }
 0x3bf   : > { %1369 = vmatmul.msk.bf16.vlgmr.msrb.gmra.mxu3 %vm477_vm6, %v533_v61 }
 0x3c0   : > { %794 = vmatpush.bf16.msra.mxu3 %v1539_v55 }
 0x3c4   : > { %795 = vmatpush.bf16.msra.mxu3 %v1538_v56 }
 0x3c8   : > { %796 = vmatpush.bf16.msra.mxu3 %v1537_v57 }
 0x3cc   : > { %797 = vmatpush.bf16.msra.mxu3 %v1536_v60 }
 0x432   : > { %v528_v62 = vpop.f32.mrf.mxu3 }
 0x43a   : > { %v530_v63 = vpop.f32.mrf.mxu3 }
 0x442   : > { %v551_v1 = vpop.f32.mrf.mxu3 }
 0x443   : > { %v552_v2 = vadd.f32 %v551_v1, %v1900_v45 }
 0x445   : > { %v555_v3 = vsel %vm497_vm7, %v552_v2, -inf }
 0x446   : > { %556 = vmax.xlane.f32.xlu0 %v555_v3 }
 0x44a   : > { %v553_v4 = vpop.f32.mrf.mxu3 }
 0x4b9   : > { %v557_v5 = vpop.xlane.xlu0 %556 }
 0x4ba   : > { %v558_v6 = vsub.f32 %v552_v2, %v557_v5 }
 0x4bc   : > { %v559_v7 = vmul.f32 1.442695, %v558_v6 }
 0x4be   : > { %1629 = vpow2.f32 %v559_v7 }
 0x4c4   : > { %v1630_v9 = vpop.eup %1629 }
 0x4c5   : > { %v561_v10 = vsel %vm497_vm7, %v1630_v9, 0.0 }
 0x4c6   : > { %562 = vadd.xlane.f32.xlu2 %v561_v10 }
 0x539   : > { %v563_v11 = vpop.xlane.xlu2 %562 }
 0x53a   : > { %1631 = vrcp.f32 %v563_v11 }
 0x540   : > { %v1632_v12 = vpop.eup %1631 }
 0x541   : > { %v565_v13 = vmul.f32 %v1632_v12, %v1630_v9 }
 0x543   : > { %v566_v14 = vpack.c.bf16 %v565_v13, %v565_v13 }
 0x545   : > { %1370 = vmatmul.msk.bf16.vlgmr.msra.gmra.mxu2 %vm497_vm7, %v566_v14 }
 0x5c8   : > { %v584_v16 = vpop.f32.mrf.mxu2 }
 0x5c9   : > { %589 = vrot.lane.b32.xlu1 %v584_v16, %s2156_s22  ;;  %s2167_s22 = smov 112  }
 0x5d0   : > { %v586_v17 = vpop.f32.mrf.mxu2 }
 0x5d1   : > { %v1612_v17 = vld [vmem:[%s2145_s3 + $0x5] ss:$0 sm:$0xff] }
 0x63b   : > { %v590_v19 = vpop.permute.xlu1 %589 }
 0x63c   : > { %v592_v20 = vsel %vm477_vm6, %v528_v62, %v590_v19 }
 0x63d   : > { %v593_v21 = vpack.c.bf16 %v592_v20, %v592_v20 }
 0x63f   : > { %1379 = vmatmul.msk.bf16.vlgmr.msrb.gmra.mxu0 %vm396_vm0, %v593_v21 }
 0x6bc   : > { %v622_v23 = vpop.f32.mrf.mxu0 }
 0x6bd   : > { %v626_v24 = vadd.f32 %v622_v23, %v1864_v0  ;;  %v1535_v0 = vld [vmem:[%s2149_s7 + $0x8] sm:$0xff] }
 0x6be   : > { %697 = vmatpush.bf16.msrb.mxu1 %v1535_v0 }
 0x6bf   : > { %v1927_v25 = vadd.f32 %v1608_v22, %v626_v24 }
 0x6c1   : > { %v637_v26 = vsel %vm396_vm0, %v1927_v25, 0.0 }
 0x6c2   : > { %638 = vadd.xlane.f32.xlu0 %v637_v26  ;;  %698 = vmatpush.bf16.msrb.mxu1 %v1534_v33 }
 0x6c4   : > { %v624_v27 = vpop.f32.mrf.mxu0 }
 0x735   : > { %v639_v28 = vpop.xlane.xlu0 %638 }
 0x736   : > { %v640_v29 = vmul.f32 %v639_v28, %v1868_v8 }
 0x738   : > { %v641_v30 = vsub.f32 %v1927_v25, %v640_v29  ;;  %v1544_v29 = vld [vmem:[%s2146_s4 + $0x10] sm:$0xff] }
 0x73a   : > { %v642_v31 = vmul.f32 %v641_v30, %v641_v30 }
 0x73c   : > { %v643_v32 = vsel %vm396_vm0, %v642_v31, 0.0 }
 0x73d   : > { %644 = vadd.xlane.f32.xlu2 %v643_v32 }
 0x7b0   : > { %v645_v34 = vpop.xlane.xlu2 %644 }
 0x7b1   : > { %v646_v35 = vmul.f32 %v645_v34, %v1868_v8 }
 0x7b3   : > { %v647_v36 = vadd.f32 1e-05, %v646_v35 }
 0x7b5   : > { %1633 = vrsqrt.f32 %v647_v36  ;;  %vm654_vm9 = vweird.f32 %v647_v36 }
 0x7bb   : > { %v1634_v37 = vpop.eup %1633 }
 0x7bc   : > { %v649_v38 = vmul.f32 %v1634_v37, %v647_v36  ;;  %vm655_vm8 = vweird.f32 %v1634_v37 }
 0x7bd   : > { %vm656_vm10 = vmor %vm654_vm9, %vm655_vm8 }
 0x7be   : > { %v650_v39 = vmul.f32 %v1634_v37, %v649_v38  ;;  %v1613_v38 = vld [vmem:[%s2145_s3 + $0x6] ss:$0 sm:$0xff] }
 0x7c0   : > { %v651_v40 = vmul.f32 0.5, %v650_v39 }
 0x7c2   : > { %v652_v41 = vsub.f32 1.5, %v651_v40 }
 0x7c4   : > { %v653_v42 = vmul.f32 %v1634_v37, %v652_v41  ;;  %v1614_v41 = vld [vmem:[%s2145_s3 + $0x7] ss:$0 sm:$0xff] }
 0x7c6   : > { %v657_v44 = vsel %vm656_vm10, %v1634_v37, %v653_v42  ;;  %vm1230_vm10 = vcmask 253952  }
 0x7c7   : > { %v658_v46 = vmul.f32 %v657_v44, %v641_v30 }
 0x7c9   : > { %v662_v48 = vmul.f32 %v1609_v43, %v658_v46  ;;  %v1615_v46 = vld [vmem:[%s2147_s5 + $0x1] ss:$0 sm:$0xff] }
 0x7cb   : > { %v666_v49 = vadd.f32 %v1610_v47, %v662_v48 }
 0x7cd   : > { %v667_v50 = vpack.c.bf16 %v666_v49, %v666_v49 }
 0x7cf   : > { %1391 = vmatmul.msk.bf16.vlgmr.msrb.gmra.mxu1 %vm396_vm0, %v667_v50 }
 0x84c   : > { %v700_v59 = vpop.f32.mrf.mxu1 }
 0x84d   : > { %v701_v61 = vadd.f32 %v1611_v58, %v700_v59 }
 0x84f   : > { %v1392_v62 = vmul.f32 -1.702, %v701_v61 }
 0x851   : > { %v706_v63 = vmul.f32 1.442695, %v1392_v62 }
 0x853   : > { %1635 = vpow2.f32 %v706_v63 }
 0x854   : > { %v702_v1 = vpop.f32.mrf.mxu1 }
 0x859   : > { %v1636_v2 = vpop.eup %1635 }
 0x85a   : > { %v708_v3 = vadd.f32 1.0, %v1636_v2 }
 0x85c   : > { %1637 = vrcp.f32 %v708_v3  ;;  %v720_v7 = vand.u32 2147483648, %v708_v3  ;;  %v718_v10 = vand.u32 2147483647, %v708_v3  ;;  %vm714_vm12 = vweird.f32 %v708_v3 }
 0x85e   : > { %v721_v12 = vor.u32 1.1754944e-38, %v720_v7  ;;  %vm719_vm14 = vcmp.eq.f32.partialorder %v718_v10, 8.507059e+37 }
 0x862   : > { %v1638_v4 = vpop.eup %1637 }
 0x863   : > { %v710_v5 = vmul.f32 %v1638_v4, %v708_v3  ;;  %vm715_vm11 = vweird.f32 %v1638_v4 }
 0x864   : > { %vm716_vm13 = vmor %vm714_vm12, %vm715_vm11 }
 0x865   : > { %v711_v6 = vsub.f32 1.0, %v710_v5 }
 0x867   : > { %v712_v9 = vmul.f32 %v1638_v4, %v711_v6 }
 0x869   : > { %v713_v11 = vadd.f32 %v1638_v4, %v712_v9 }
 0x86b   : > { %v717_v13 = vsel %vm716_vm13, %v1638_v4, %v713_v11 }
 0x86c   : > { %v722_v14 = vsel %vm719_vm14, %v721_v12, %v717_v13 }
 0x86d   : > { %v724_v15 = vmul.f32 %v722_v14, %v701_v61 }
 0x86f   : > { %v725_v16 = vpack.c.bf16 %v724_v15, %v724_v15 }
 0x871   : > { %798 = vmatmul.bf16.vlgmr.msra.gmra.mxu3 %v725_v16 }
 0x8f4   : > { %v799_v18 = vpop.f32.mrf.mxu3 }
 0x8f5   : > { %v803_v19 = vadd.f32 %v799_v18, %v1927_v25  ;;  %v1545_v25 = vld [vmem:[%s2146_s4 + $0x18] sm:$0xff] }
 0x8f6   : > { %876 = vmatpush.bf16.msrb.mxu2 %v1545_v25 }
 0x8f7   : > { %v1979_v20 = vadd.f32 %v1612_v17, %v803_v19 }
 0x8f9   : > { %v814_v21 = vsel %vm396_vm0, %v1979_v20, 0.0 }
 0x8fa   : > { %815 = vadd.xlane.f32.xlu1 %v814_v21  ;;  %877 = vmatpush.bf16.msrb.mxu2 %v1544_v29 }
 0x8fc   : > { %v801_v22 = vpop.f32.mrf.mxu3 }
 0x96d   : > { %v816_v23 = vpop.xlane.xlu1 %815 }
 0x96e   : > { %v817_v24 = vmul.f32 %v816_v23, %v1868_v8 }
 0x970   : > { %v818_v26 = vsub.f32 %v1979_v20, %v817_v24 }
 0x972   : > { %v819_v27 = vmul.f32 %v818_v26, %v818_v26 }
 0x974   : > { %v820_v28 = vsel %vm396_vm0, %v819_v27, 0.0  ;;  %v1547_v27 = vld [vmem:[%s2148_s6 + $0x18] sm:$0xff] }
 0x975   : > { %821 = vadd.xlane.f32.xlu0 %v820_v28 }
 0x9e8   : > { %v822_v30 = vpop.xlane.xlu0 %821 }
 0x9e9   : > { %v823_v31 = vmul.f32 %v822_v30, %v1868_v8 }
 0x9eb   : > { %v824_v32 = vadd.f32 1e-05, %v823_v31  ;;  %v1546_v31 = vld [vmem:[%s2148_s6 + $0x10] sm:$0xff] }
 0x9ed   : > { %1639 = vrsqrt.f32 %v824_v32  ;;  %vm831_vm1 = vweird.f32 %v824_v32 }
 0x9f3   : > { %v1640_v0 = vpop.eup %1639 }
 0x9f4   : > { %v826_v33 = vmul.f32 %v1640_v0, %v824_v32  ;;  %vm832_vm15 = vweird.f32 %v1640_v0 }
 0x9f5   : > { %vm833_vm2 = vmor %vm831_vm1, %vm832_vm15 }
 0x9f6   : > { %v827_v34 = vmul.f32 %v1640_v0, %v826_v33 }
 0x9f8   : > { %v828_v35 = vmul.f32 0.5, %v827_v34  ;;  %v1616_v34 = vld [vmem:[%s2145_s3 + $0xa] ss:$0 sm:$0xff] }
 0x9fa   : > { %v829_v36 = vsub.f32 1.5, %v828_v35 }
 0x9fc   : > { %v830_v37 = vmul.f32 %v1640_v0, %v829_v36 }
 0x9fe   : > { %v834_v39 = vsel %vm833_vm2, %v1640_v0, %v830_v37 }
 0x9ff   : > { %v835_v40 = vmul.f32 %v834_v39, %v818_v26 }
 0xa01   : > { %v839_v42 = vmul.f32 %v1613_v38, %v835_v40 }
 0xa03   : > { %v843_v43 = vadd.f32 %v1614_v41, %v839_v42 }
 0xa05   : > { %v844_v44 = vpack.c.bf16 %v843_v43, %v843_v43 }
 0xa07   : > { %1441 = vmatmul.msk.bf16.vlgmr.msrb.gmra.mxu2 %vm396_vm0, %v844_v44 }
 0xa8a   : > { %v879_v47 = vpop.f32.mrf.mxu2 }
 0xa8b   : > { %v880_v48 = vadd.f32 %v1615_v46, %v879_v47  ;;  %v1548_v46 = vld [vmem:[%s2149_s7 + $0x10] sm:$0xff] }
 0xa8d   : > { %v883_v49 = vpack.c.bf16 %v880_v48, %v880_v48 }
 0xa8f   : > { %v885_v50 = vunpack.c.l.b16 %v883_v49 }
 0xa91   : > { %v886_v51 = vpack.c.b16 %v885_v50, %v885_v50 }
 0xa92   : > { %v881_v52 = vpop.f32.mrf.mxu2 }
 0xa93   : > { %941 = vrot.lane.b32.xlu0 %v886_v51, %s2167_s22  ;;  %943 = vrot.lane.b32.xlu2 %v886_v51, %s2168_s14  ;;  %s1224_s22 = sld [smem:[#allocation4 + %s1832_s0]] }
 0xa99   : > { %s1225_s14 = scalar_lea.vmem [#allocation2], %s1224_s22 }
 0xa9b   : > { %887 = vrot.lane.b32.xlu2 %v886_v51, %s2169_s29 }
 0xaed   : > { %v944_v53 = vpop.permute.xlu2 %943 }
 0xaee   : > { %v949_v54 = vsel %vm477_vm6, %v944_v53, 0 }
 0xaef   : > { %958 = vmatpush.bf16.xpose.msra.mxu2 %v949_v54 }
 0xaf5   : > { %v888_v55 = vpop.permute.xlu2 %887 }
 0xaf6   : > { %v893_v56 = vsel %vm477_vm6, %v888_v55, 0 }
 0xaf7   : > { %902 = vmatpush.bf16.xpose.msra.mxu0 %v893_v56  ;;  %v1617_v56 = vld [vmem:[%s2145_s3 + $0x8] ss:$0 sm:$0xff] }
 0xafe   : > { %1442 = vmatmul.msk.bf16.vlgmr.msra.gmra.mxu0 %vm477_vm6, %v883_v49 }
 0xb05   : > { %v942_v57 = vpop.permute.xlu0 %941 }
 0xb06   : > { %1444 = vmatmul.msk.bf16.vlgmr.msra.gmra.mxu2 %vm477_vm6, %v942_v57 }
 0xb7b   : > { %v904_v58 = vpop.f32.mrf.mxu0 }
 0xb7c   : > { %v905_v59 = vadd.f32 %v904_v58, %v1900_v45 }
 0xb7e   : > { %v908_v60 = vsel %vm497_vm7, %v905_v59, -inf }
 0xb7f   : > { %909 = vmax.xlane.f32.xlu2 %v908_v60 }
 0xb83   : > { %v906_v61 = vpop.f32.mrf.mxu0 }
 0xb89   : > { %v960_v62 = vpop.f32.mrf.mxu2 }
 0xb8a   : > { %v961_v63 = vadd.f32 %v960_v62, %v1900_v45 }
 0xb8c   : > { %v964_v1 = vsel %vm497_vm7, %v961_v63, -inf }
 0xb8d   : > { %965 = vmax.xlane.f32.xlu0 %v964_v1  ;;  %v1556_v1 = vld [vmem:[%s2151_s9 + $0x70] sm:$0xff] }
 0xb91   : > { %v962_v2 = vpop.f32.mrf.mxu2 }
 0xb92   : > { %v1555_v2 = vld [vmem:[%s2151_s9 + $0x68] sm:$0xff] }
 0xbf2   : > { %v910_v3 = vpop.xlane.xlu2 %909 }
 0xbf3   : > { %v911_v4 = vsub.f32 %v905_v59, %v910_v3  ;;  %v1618_v59 = vld [vmem:[%s2145_s3 + $0x9] ss:$0 sm:$0xff]  ;;  %v1554_v3 = vld [vmem:[%s2151_s9 + $0x60] sm:$0xff] }
 0xbf5   : > { %v912_v5 = vmul.f32 1.442695, %v911_v4  ;;  %v1553_v4 = vld [vmem:[%s2151_s9 + $0x58] sm:$0xff] }
 0xbf7   : > { %1641 = vpow2.f32 %v912_v5  ;;  %v1552_v5 = vld [vmem:[%s2151_s9 + $0x50] sm:$0xff] }
 0xbfd   : > { %v1642_v6 = vpop.eup %1641 }
 0xbfe   : > { %v914_v7 = vsel %vm497_vm7, %v1642_v6, 0.0 }
 0xbff   : > { %915 = vadd.xlane.f32.xlu0 %v914_v7  ;;  %v1619_v7 = vld [vmem:[%s2150_s8 + $0x1] ss:$0 sm:$0xff] }
 0xc00   : > { %v966_v9 = vpop.xlane.xlu0 %965 }
 0xc01   : > { %v967_v10 = vsub.f32 %v961_v63, %v966_v9  ;;  %v1557_v63 = vld [vmem:[%s2151_s9 + $0x78] sm:$0xff] }
 0xc02   : > { %1203 = vmatpush.bf16.msrb.mxu2 %v1557_v63 }
 0xc03   : > { %v968_v11 = vmul.f32 1.442695, %v967_v10  ;;  %v1550_v10 = vld [vmem:[%s2151_s9 + $0x40] sm:$0xff] }
 0xc05   : > { %1643 = vpow2.f32 %v968_v11 }
 0xc06   : > { %1204 = vmatpush.bf16.msrb.mxu2 %v1556_v1 }
 0xc0a   : > { %1205 = vmatpush.bf16.msrb.mxu2 %v1555_v2 }
 0xc0b   : > { %v1644_v12 = vpop.eup %1643 }
 0xc0c   : > { %v970_v13 = vsel %vm497_vm7, %v1644_v12, 0.0 }
 0xc0d   : > { %971 = vadd.xlane.f32.xlu1 %v970_v13 }
 0xc0e   : > { %1206 = vmatpush.bf16.msrb.mxu2 %v1554_v3 }
 0xc12   : > { %1207 = vmatpush.bf16.msrb.mxu2 %v1553_v4 }
 0xc16   : > { %1208 = vmatpush.bf16.msrb.mxu2 %v1552_v5 }
 0xc26   : > { %976 = vrot.lane.b32.xlu1 %v886_v51, %s2170_s18 }
 0xc2e   : > { %920 = vrot.lane.b32.xlu1 %v886_v51, %s2171_s20  ;;  %s384_s20 = sand.u32 1, %s1725_s26  }
 0xc2f   : > { %s385_s23 = scalar_lea.vmem [#allocation5], %s384_s20 }
 0xc30   : > { %s1294_s19 = sshll.u32 %s385_s23, 4  ;;  %s1295_s19 = int_to_ptr.vmem [resolvable:$true] %s1294_s19 }
 0xc72   : > { %v916_v14 = vpop.xlane.xlu0 %915 }
 0xc80   : > { %v972_v45 = vpop.xlane.xlu1 %971 }
 0xc81   : > { %1645 = vrcp.f32 %v972_v45 }
 0xc82   : > { %1647 = vrcp.f32 %v916_v14 }
 0xc87   : > { %v1646_v15 = vpop.eup %1645 }
 0xc88   : > { %v974_v16 = vmul.f32 %v1646_v15, %v1644_v12  ;;  %v1648_v21 = vpop.eup %1647 }
 0xc89   : > { %v918_v22 = vmul.f32 %v1648_v21, %v1642_v6  ;;  %v1551_v6 = vld [vmem:[%s2151_s9 + $0x48] sm:$0xff] }
 0xc8a   : > { %v975_v19 = vpack.c.bf16 %v974_v16, %v974_v16  ;;  %1209 = vmatpush.bf16.msrb.mxu2 %v1551_v6 }
 0xc8b   : > { %v919_v26 = vpack.c.bf16 %v918_v22, %v918_v22 }
 0xc8e   : > { %1210 = vmatpush.bf16.msrb.mxu2 %v1550_v10 }
 0xc98   : > { %v977_v17 = vpop.permute.xlu1 %976 }
 0xc99   : > { %v982_v18 = vsel %vm515_vm5, %v977_v17, 0 }
 0xc9a   : > { %991 = vmatpush.bf16.msrb.mxu0 %v982_v18 }
 0xc9d   : > { %1445 = vmatmul.msk.bf16.vlgmr.msrb.gmra.mxu0 %vm497_vm7, %v975_v19 }
 0xca0   : > { %v921_v23 = vpop.permute.xlu1 %920 }
 0xca1   : > { %v926_v24 = vsel %vm515_vm5, %v921_v23, 0 }
 0xca2   : > { %935 = vmatpush.bf16.msra.mxu1 %v926_v24 }
 0xca5   : > { %1443 = vmatmul.msk.bf16.vlgmr.msra.gmra.mxu1 %vm497_vm7, %v919_v26 }
 0xca6   : > { %1029 = vmatpush.bf16.msrb.mxu1 %v1547_v27 }
 0xcaa   : > { %1030 = vmatpush.bf16.msrb.mxu1 %v1546_v31 }
 0xd1a   : > { %v993_v28 = vpop.f32.mrf.mxu0 }
 0xd1b   : > { %998 = vrot.lane.b32.xlu2 %v993_v28, %s2172_s13  ;;  %s1292_s13 = scalar_lea.hbm %s2154_s12, %s1832_s0 }
 0xd1c   : > { %s1296_s22 = sshll.u32 %s1292_s13, 4  ;;  %s1297_s22 = int_to_ptr.hbm [resolvable:$true] %s1296_s22 }
 0xd1d   : > { %s1683_s29 = sshra.s32 %s1297_s22, 4  ;;  %s1684_s29 = int_to_ptr.hbm [resolvable:$true] %s1683_s29 }
 0xd1e   : > { %s1685_s18 = scalar_lea.hbm %s1684_s29, 1  ;;  %p1690_p0 = scmp.lt.s32.totalorder %s1684_s29, %s2154_s12 }
 0xd1f   : > { %p1686_p11 = scmp.ne.s32.totalorder %s1684_s29, %s1685_s18  ;;  %p1691_p1 = scmp.lt.s32.totalorder %s1689_s24, %s1685_s18 }
 0xd21   : > { %p1687_p12 = pnand %p1686_p11, %p1849_p5  ;;  %p1692_p2 = por %p1691_p1, %p1690_p0 }
 0xd22   : > { %v937_v25 = vpop.f32.mrf.mxu1  ;;  %v995_v29 = vpop.f32.mrf.mxu0 }
 0xd23   : > { %v1620_v29 = vld [vmem:[%s2145_s3 + $0xb] ss:$0 sm:$0xff]  ;;  %p1688_p13 = pneg %p1687_p12 }
 0xd25   : > { %p1693_p3 = pnand %p1692_p2, %p1688_p13 }
 0xd2a   : > { %v939_v30 = vpop.f32.mrf.mxu1 }
 0xd75   : > { %v999_v32 = vpop.permute.xlu2 %998 }
 0xd76   : > { %v1001_v0 = vsel %vm477_vm6, %v937_v25, %v999_v32 }
 0xd77   : > { %v1002_v33 = vpack.c.bf16 %v1001_v0, %v1001_v0 }
 0xd79   : > { %1458 = vmatmul.msk.bf16.vlgmr.msrb.gmra.mxu1 %vm396_vm0, %v1002_v33 }
 0xdf6   : > { %v1032_v35 = vpop.f32.mrf.mxu1 }
 0xdf7   : > { %v1036_v36 = vadd.f32 %v1032_v35, %v1979_v20  ;;  %v1549_v20 = vld [vmem:[%s2149_s7 + $0x18] sm:$0xff] }
 0xdf8   : > { %1109 = vmatpush.bf16.msrb.mxu3 %v1549_v20 }
 0xdf9   : > { %v2035_v37 = vadd.f32 %v1616_v34, %v1036_v36 }
 0xdfb   : > { %v1047_v38 = vsel %vm396_vm0, %v2035_v37, 0.0 }
 0xdfc   : > { %1048 = vadd.xlane.f32.xlu0 %v1047_v38  ;;  %1110 = vmatpush.bf16.msrb.mxu3 %v1548_v46 }
 0xdfe   : > { %v1034_v39 = vpop.f32.mrf.mxu1 }
 0xe6f   : > { %v1049_v40 = vpop.xlane.xlu0 %1048 }
 0xe70   : > { %v1050_v41 = vmul.f32 %v1049_v40, %v1868_v8 }
 0xe72   : > { %v1051_v42 = vsub.f32 %v2035_v37, %v1050_v41  ;;  %v1257_v41 = vld [vmem:[%s2153_s11 + $0x10] sm:$0xff] }
 0xe74   : > { %v1052_v43 = vmul.f32 %v1051_v42, %v1051_v42 }
 0xe76   : > { %v1053_v44 = vsel %vm396_vm0, %v1052_v43, 0.0  ;;  %v1255_v43 = vld [vmem:[%s2153_s11] sm:$0xff] }
 0xe77   : > { %1054 = vadd.xlane.f32.xlu1 %v1053_v44 }
 0xeea   : > { %v1055_v47 = vpop.xlane.xlu1 %1054 }
 0xeeb   : > { %v1056_v48 = vmul.f32 %v1055_v47, %v1868_v8 }
 0xeed   : > { %v1057_v49 = vadd.f32 1e-05, %v1056_v48 }
 0xeef   : > { %1649 = vrsqrt.f32 %v1057_v49  ;;  %vm1064_vm4 = vweird.f32 %v1057_v49 }
 0xef5   : > { %v1650_v50 = vpop.eup %1649 }
 0xef6   : > { %v1059_v51 = vmul.f32 %v1650_v50, %v1057_v49  ;;  %vm1065_vm3 = vweird.f32 %v1650_v50 }
 0xef7   : > { %vm1066_vm5 = vmor %vm1064_vm4, %vm1065_vm3 }
 0xef8   : > { %v1060_v52 = vmul.f32 %v1650_v50, %v1059_v51 }
 0xefa   : > { %v1061_v53 = vmul.f32 0.5, %v1060_v52 }
 0xefc   : > { %v1062_v54 = vsub.f32 1.5, %v1061_v53  ;;  %v1227_v53 = vld [vmem:[%s2152_s10] sm:$0x1] }
 0xefe   : > { %v1063_v55 = vmul.f32 %v1650_v50, %v1062_v54 }
 0xf00   : > { %v1067_v57 = vsel %vm1066_vm5, %v1650_v50, %v1063_v55 }
 0xf01   : > { %v1068_v58 = vmul.f32 %v1067_v57, %v1051_v42  ;;  %v1256_v42 = vld [vmem:[%s2153_s11 + $0x8] sm:$0xff] }
 0xf03   : > { %v1072_v60 = vmul.f32 %v1617_v56, %v1068_v58 }
 0xf05   : > { %v1076_v61 = vadd.f32 %v1618_v59, %v1072_v60 }
 0xf07   : > { %v1077_v62 = vpack.c.bf16 %v1076_v61, %v1076_v61 }
 0xf09   : > { %1475 = vmatmul.msk.bf16.vlgmr.msrb.gmra.mxu3 %vm396_vm0, %v1077_v62 }
 0xf8c   : > { %v1112_v9 = vpop.f32.mrf.mxu3 }
 0xf8d   : > { %v1113_v11 = vadd.f32 %v1619_v7, %v1112_v9 }
 0xf8f   : > { %v1476_v12 = vmul.f32 -1.702, %v1113_v11 }
 0xf91   : > { %v1118_v13 = vmul.f32 1.442695, %v1476_v12 }
 0xf93   : > { %1651 = vpow2.f32 %v1118_v13 }
 0xf94   : > { %v1114_v45 = vpop.f32.mrf.mxu3 }
 0xf99   : > { %v1652_v14 = vpop.eup %1651 }
 0xf9a   : > { %v1120_v15 = vadd.f32 1.0, %v1652_v14 }
 0xf9c   : > { %1653 = vrcp.f32 %v1120_v15  ;;  %v1132_v19 = vand.u32 2147483648, %v1120_v15  ;;  %v1130_v22 = vand.u32 2147483647, %v1120_v15  ;;  %vm1126_vm7 = vweird.f32 %v1120_v15 }
 0xf9e   : > { %v1133_v24 = vor.u32 1.1754944e-38, %v1132_v19  ;;  %vm1131_vm9 = vcmp.eq.f32.partialorder %v1130_v22, 8.507059e+37 }
 0xfa2   : > { %v1654_v16 = vpop.eup %1653 }
 0xfa3   : > { %v1122_v17 = vmul.f32 %v1654_v16, %v1120_v15  ;;  %vm1127_vm6 = vweird.f32 %v1654_v16 }
 0xfa4   : > { %vm1128_vm8 = vmor %vm1126_vm7, %vm1127_vm6 }
 0xfa5   : > { %v1123_v18 = vsub.f32 1.0, %v1122_v17 }
 0xfa7   : > { %v1124_v21 = vmul.f32 %v1654_v16, %v1123_v18 }
 0xfa9   : > { %v1125_v23 = vadd.f32 %v1654_v16, %v1124_v21 }
 0xfab   : > { %v1129_v26 = vsel %vm1128_vm8, %v1654_v16, %v1125_v23 }
 0xfac   : > { %v1134_v27 = vsel %vm1131_vm9, %v1133_v24, %v1129_v26 }
 0xfad   : > { %v1136_v28 = vmul.f32 %v1134_v27, %v1113_v11 }
 0xfaf   : > { %v1137_v25 = vpack.c.bf16 %v1136_v28, %v1136_v28 }
 0xfb1   : > { %1211 = vmatmul.bf16.vlgmr.msrb.gmra.mxu2 %v1137_v25 }
0x1034   : > { %v1212_v30 = vpop.f32.mrf.mxu2 }
0x1035   : > { %v1216_v31 = vadd.f32 %v1212_v30, %v2035_v37  ;;  %v1258_v37 = vld [vmem:[%s2153_s11 + $0x18] sm:$0xff] }
0x1036   : > { %1274 = vmatpush.msra.mxu0 %v1258_v37 }
0x1037   : > { %v1222_v32 = vadd.f32 %v1620_v29, %v1216_v31 }
0x1038   : > { %1275 = vmatpush.msra.mxu0 %v1257_v41 }
0x1039   : > { %1223 = vst.msk [vmem:[#allocation2] sm:$0xff] %vm396_vm0, %v1222_v32 }
0x103a   : > { %1276 = vmatpush.msra.mxu0 %v1256_v42 }
0x103c   : > { %v1214_v0 = vpop.f32.mrf.mxu2  ;;  %1277 = vmatpush.msra.mxu0 %v1255_v43 }
0x1040   : > { %v1226_v33 = vld [vmem:[%s1225_s14] sm:$0x1]  ;;  %s1284_s14 = scalar_lea.sflag [#allocation6], %s384_s20 }
0x1041   : > { %v1231_v34 = vsel %vm1230_vm10, %v1226_v33, 0.0 }
0x1042   : > { %1232 = vadd.xlane.f32.xlu0 %v1231_v34 }
0x10b5   : > { %v1233_v35 = vpop.xlane.xlu0 %1232 }
0x10b6   : > { %v1234_v36 = vmul.f32 %v1233_v35, %v1868_v8 }
0x10b8   : > { %v1235_v38 = vsub.f32 %v1226_v33, %v1234_v36 }
0x10ba   : > { %v1236_v39 = vmul.f32 %v1235_v38, %v1235_v38 }
0x10bc   : > { %v1237_v40 = vsel %vm1230_vm10, %v1236_v39, 0.0 }
0x10bd   : > { %1238 = vadd.xlane.f32.xlu0 %v1237_v40 }
0x1130   : > { %v1239_v44 = vpop.xlane.xlu0 %1238 }
0x1131   : > { %v1240_v20 = vmul.f32 %v1239_v44, %v1868_v8  ;;  %v1526_v8 = vld [vmem:[%s2152_s10 + $0x1] sm:$0x1] }
0x1133   : > { %v1241_v46 = vadd.f32 1e-05, %v1240_v20 }
0x1135   : > { %1655 = vrsqrt.f32 %v1241_v46  ;;  %vm1248_vm12 = vweird.f32 %v1241_v46 }
0x113b   : > { %v1656_v47 = vpop.eup %1655 }
0x113c   : > { %v1243_v48 = vmul.f32 %v1656_v47, %v1241_v46  ;;  %vm1249_vm11 = vweird.f32 %v1656_v47 }
0x113d   : > { %vm1250_vm13 = vmor %vm1248_vm12, %vm1249_vm11 }
0x113e   : > { %v1244_v49 = vmul.f32 %v1656_v47, %v1243_v48 }
0x1140   : > { %v1245_v50 = vmul.f32 0.5, %v1244_v49 }
0x1142   : > { %v1246_v51 = vsub.f32 1.5, %v1245_v50 }
0x1144   : > { %v1247_v52 = vmul.f32 %v1656_v47, %v1246_v51 }
0x1146   : > { %v1251_v54 = vsel %vm1250_vm13, %v1656_v47, %v1247_v52 }
0x1147   : > { %v1252_v55 = vmul.f32 %v1251_v54, %v1235_v38 }
0x1149   : > { %v1253_v56 = vmul.f32 %v1252_v55, %v1227_v53 }
0x114b   : > { %v1254_v57 = vadd.f32 %v1526_v8, %v1253_v56 }
0x114d   : > { %1527 = vmatmul.msk.f32.vlgmr.msra.gmra.mxu0 %vm396_vm0, %v1254_v57 }
0x11ca   : > { %v1279_v58 = vpop.f32.mrf.mxu0 }
0x11cb   : > { %1282 = vst [vmem:[%s385_s23] sm:$0x1] %v1279_v58 }
0x11cc   : > { %1696 = shalt.err (!%p1693_p3)
}
0x11cd   : > { %1558 = dma.vmem_to_hbm [thread:$0]  (%p1849_p5), %s1295_s19, 16, %s1297_s22, %s1284_s14  }
0x11ce PF: > { %p1564_p4 = scmp.ge.s32.totalorder %s1733_s28, 2  ;;  %s1308_s20 = sand.u32 1, %s1721_s25  }
0x11cf   : > { %s1309_s1 = scalar_lea.sflag [#allocation6], %s1308_s20 }
0x11d0   : > { %p1561_p7 = pnand %p1564_p4, %p1853_p6 }
0x11d2   : > { %p1562_p8 = pneg %p1561_p7 }
0x11d4   : > { %1716 = dma.done.wait (%p1562_p8), %s1309_s1, 16  }
0x11d5   : > { %1718 = vsyncadd (%p1562_p8), %s1309_s1, 4294967280  ;;  %p30_p9 = scmp.ge.s32.totalorder %s1836_s30, 4   ;;  %s2173_s25 = smov %s1725_s26 }
0x11d6   : > { %s2174_s26 = smov %s1729_s27  ;;  %s2175_s27 = smov %s1847_s15 }
0x11d7   : > { %s2176_s28 = smov %s1836_s30  ;;  %32 = sbr.rel (!%p30_p9) target bundleno = 10 (0xa), region = 118 }
0x11dc   :  { %1314 = vsyncpa [#allocation6], 1 }
0x11dd   :  { %1316 = vsyncpa [#allocation6 + $0x1], 1 }

</bundles_post_ra>
